<compile_context>
chip_gen: v6e
topology: v6e:2x2x1
jax: 0.10.0
libtpu: 0.0.40
codegen_flags: <defaults>
</compile_context>

<pallas_src>
import functools

import jax
import jax.numpy as jnp
from jax.experimental import pallas as pl
from jax.experimental.pallas import tpu as pltpu

# ------------------------- model dimensions (EfficientNet-b1 head) ----------
EFNET_IN_FEATURES = 1280      # efficientnet-b1 ._fc.in_features
META_LEN = 24
META_FEATURES = 256           # self.meta_features
FINAL_FC_FEATURES = 128       # self.final_fc_features
STEM_CH = 32                  # stand-in backbone stem channels
KSIZE, STRIDE, PAD = 3, 2, 1
K_RAW = KSIZE * KSIZE * 3     # 27 im2col channels
K_PAD = 32                    # contraction dim padded (zeros) for clean layout
BN_EPS = 1e-5


def _round_up(n, m):
    return ((n + m - 1) // m) * m


def _silu(x):
    # x*sigmoid(x) == x*0.5*(tanh(x/2)+1): one EUP transcendental per element
    # (sigmoid would lower to exp + reciprocal -> two EUP pushes on the hot path).
    return x * (0.5 * jnp.tanh(x * 0.5) + 0.5)


@functools.lru_cache(maxsize=None)
def _hw_defaults():
    """(max_tile_rows, vmem_limit_bytes) per TPU generation."""
    try:
        big_vmem = pltpu.get_tpu_info().vmem_capacity_bytes >= (100 << 20)
    except Exception:            # conservative fallback (works everywhere)
        big_vmem = False
    if big_vmem:                 # v5e / v6e: 128 MiB VMEM -> bigger tiles, fewer steps
        return 2048, 64 << 20
    return 1024, 32 << 20        # v7x: 64 MiB physical VMEM -> keep 1024 / 32 MiB


def _pick_tile_p(P, max_tile):
    """Largest good row tile; prefer an exact divisor of P (no tail mask)."""
    if P <= max_tile:
        return _round_up(P, 8)
    for cand in range(max_tile, 7, -1):
        if cand % 8 == 0 and P % cand == 0:
            if cand >= max_tile // 2:
                return cand
            break
    return max_tile              # ragged tail, masked on the last tile only


# ------------------------------ kernel 1: backbone + pool --------------------
def backbone_pool_kernel(patches_ref,                 # (1, tile_p, K_PAD) bf16
                         stem_w_ref, stem_b_ref,      # stem conv (BN scale folded) + bias
                         head_w_ref, head_b_ref,      # 1x1 head conv (BN folded) + bias
                         feat_ref,                    # (1, 1, 1280) f32 resident out block
                         *, positions, tile_p, ragged):
    t = pl.program_id(1)
    last_t = pl.num_programs(1) - 1

    @pl.when(t == 0)
    def _init():
        feat_ref[...] = jnp.zeros_like(feat_ref)

    # ---- stem 3x3/s2 conv as im2col matmul (bf16 MXU, f32 acc) + bias + SiLU ----
    x = patches_ref[0]                                                  # (tile_p, 32) bf16
    stem = jnp.dot(x, stem_w_ref[...], preferred_element_type=jnp.float32)
    stem = _silu(stem + stem_b_ref[...])                                # (tile_p, 32) f32

    # ---- 1x1 head conv + bias + SiLU; activation never leaves VMEM --------------
    y = jnp.dot(stem.astype(jnp.bfloat16), head_w_ref[...],
                preferred_element_type=jnp.float32)                     # (tile_p, 1280) f32
    y = _silu(y + head_b_ref[...])

    # ---- global average pool: direct per-batch-row accumulation ----------------
    if ragged:
        @pl.when(t != last_t)
        def _acc_full():
            feat_ref[0] += jnp.sum(y, axis=0, keepdims=True)

        @pl.when(t == last_t)
        def _acc_masked():                                              # tail rows only
            pos = t * tile_p + jax.lax.broadcasted_iota(jnp.int32, (tile_p, 1), 0)
            ym = jnp.where(pos < positions, y, 0.0)
            feat_ref[0] += jnp.sum(ym, axis=0, keepdims=True)
    else:
        feat_ref[0] += jnp.sum(y, axis=0, keepdims=True)

    @pl.when(t == last_t)
    def _finalize():
        feat_ref[...] *= jnp.float32(1.0 / positions)


# ------------------------------ kernel 2: meta-MLP + final_fc ----------------
def head_mlp_kernel(feat_ref, meta_ref,
                    w1_ref, b1_ref, w2_ref, b2_ref,
                    w3a_ref, w3b_ref, b3_ref, w4_ref, b4_ref,
                    out_ref):
    # self.drop / meta_path dropouts: inference-mode identities.
    feat = feat_ref[...]                                                # (B, 1280) f32
    m = meta_ref[...]                                                   # (B, 24) f32
    # meta_path: Linear(24,512) -> ReLU -> Linear(512,256) -> BN1d (folded) -> ReLU
    h1 = jnp.maximum(jnp.dot(m, w1_ref[...], preferred_element_type=jnp.float32)
                     + b1_ref[...], 0.0)
    h2 = jnp.maximum(jnp.dot(h1, w2_ref[...], preferred_element_type=jnp.float32)
                     + b2_ref[...], 0.0)
    # final_fc on concat(features, meta_out): split weight -> two matmuls.
    h3 = jnp.maximum(jnp.dot(feat, w3a_ref[...], preferred_element_type=jnp.float32)
                     + jnp.dot(h2, w3b_ref[...], preferred_element_type=jnp.float32)
                     + b3_ref[...], 0.0)
    out_ref[...] = (jnp.dot(h3, w4_ref[...], preferred_element_type=jnp.float32)
                    + b4_ref[...])


# ------------------------------ JAX glue -------------------------------------
def im2col_nhwc_bf16(x_nhwc, ksize=KSIZE, stride=STRIDE, pad=PAD):
    """3x3/s2 patch extraction -> (B, Ho*Wo, K_PAD) bf16 (27 real taps + zero pad)."""
    # TODO(synk): the 9-tap gather is materialized in HBM (~2.25x input bytes); the
    # kernel is compute-bound so this stays in the wrapper (review: deprioritized).
    B, H, W, C = x_nhwc.shape
    xp = jnp.pad(x_nhwc, ((0, 0), (pad, pad), (pad, pad), (0, 0)))
    Ho = (H + 2 * pad - ksize) // stride + 1
    Wo = (W + 2 * pad - ksize) // stride + 1
    cols = []
    for dy in range(ksize):
        for dx in range(ksize):
            cols.append(xp[:, dy:dy + stride * (Ho - 1) + 1:stride,
                              dx:dx + stride * (Wo - 1) + 1:stride, :].astype(jnp.bfloat16))
    cols.append(jnp.zeros((B, Ho, Wo, K_PAD - ksize * ksize * C), jnp.bfloat16))
    patches = jnp.concatenate(cols, axis=-1)                  # (B, Ho, Wo, K_PAD)
    return patches.reshape(B, Ho * Wo, K_PAD), Ho, Wo


def _fold_params(params):
    """Fold eval-mode BN scales into the matmul weights (only bias adds in-kernel)."""
    stem_w = jnp.pad(params["stem_w"] * params["stem_scale"],
                     ((0, K_PAD - K_RAW), (0, 0))).astype(jnp.bfloat16)
    head_w = (params["head_w"] * params["head_scale"]).astype(jnp.bfloat16)
    w2f = params["w2"] * params["bn_s"]
    b2f = params["b2"] * params["bn_s"] + params["bn_b"]
    return stem_w, head_w, w2f, b2f


def init_params(key):
    ks = list(jax.random.split(key, 24))

    def nrm(k, shape, scale):
        return (jax.random.normal(k, shape, jnp.float32) * scale).astype(jnp.float32)

    def bn_fold(k, dim):
        kg, kb, km, kv = jax.random.split(k, 4)
        gamma = 1.0 + 0.1 * jax.random.normal(kg, (1, dim), jnp.float32)
        beta = 0.1 * jax.random.normal(kb, (1, dim), jnp.float32)
        mean = 0.05 * jax.random.normal(km, (1, dim), jnp.float32)
        var = 1.0 + 0.1 * jnp.abs(jax.random.normal(kv, (1, dim), jnp.float32))
        scale = gamma / jnp.sqrt(var + BN_EPS)
        bias = beta - mean * scale
        return scale, bias

    p = {}
    # stand-in backbone
    p["stem_w"] = nrm(ks[0], (K_RAW, STEM_CH), 0.15)
    p["stem_scale"], p["stem_bias"] = bn_fold(ks[1], STEM_CH)
    p["head_w"] = nrm(ks[2], (STEM_CH, EFNET_IN_FEATURES), 0.1)
    p["head_scale"], p["head_bias"] = bn_fold(ks[3], EFNET_IN_FEATURES)
    # meta_path
    p["w1"] = nrm(ks[4], (META_LEN, META_FEATURES * 2), 0.1)
    p["b1"] = nrm(ks[5], (1, META_FEATURES * 2), 0.02)
    p["w2"] = nrm(ks[6], (META_FEATURES * 2, META_FEATURES), 0.05)
    p["b2"] = nrm(ks[7], (1, META_FEATURES), 0.02)
    p["bn_s"], p["bn_b"] = bn_fold(ks[8], META_FEATURES)
    # final_fc  (concat weight split into feature / meta parts)
    p["w3a"] = nrm(ks[9], (EFNET_IN_FEATURES, FINAL_FC_FEATURES), 0.03)
    p["w3b"] = nrm(ks[10], (META_FEATURES, FINAL_FC_FEATURES), 0.03)
    p["b3"] = nrm(ks[11], (1, FINAL_FC_FEATURES), 0.02)
    p["w4"] = nrm(ks[12], (FINAL_FC_FEATURES, 1), 0.1)
    p["b4"] = nrm(ks[13], (1, 1), 0.02)
    return p


def _const_spec(shape):
    """Whole-array VMEM block, constant across the grid (no re-fetch per step)."""
    n = len(shape)
    return pl.BlockSpec(shape, lambda b, t, _n=n: (0,) * _n)


@functools.partial(jax.jit, static_argnames=("tile_p",))
def efnet_forward(params, x_nchw, meta, *, tile_p=None):
    B = x_nchw.shape[0]
    max_tile, vmem_limit = _hw_defaults()

    x = jnp.transpose(x_nchw, (0, 2, 3, 1)).astype(jnp.float32)        # NCHW -> NHWC
    patches, Ho, Wo = im2col_nhwc_bf16(x)                              # (B, P, 32) bf16
    P = Ho * Wo
    if tile_p is None:
        tile_p = _pick_tile_p(P, max_tile)
    P_pad = _round_up(P, tile_p)
    num_tiles = P_pad // tile_p
    ragged = P_pad != P
    if ragged:
        patches = jnp.pad(patches, ((0, 0), (0, P_pad - P), (0, 0)))

    stem_w, head_w, w2f, b2f = _fold_params(params)
    meta_f32 = meta.astype(jnp.float32)

    # ---- cost estimate (helps XLA schedule around the custom call) ------------
    flops = int(2 * B * P_pad * (K_PAD * STEM_CH + STEM_CH * EFNET_IN_FEATURES))
    transcendentals = int(B * P_pad * (STEM_CH + EFNET_IN_FEATURES))
    bytes_accessed = (int(patches.size) * 2 + int(stem_w.size) * 2 + int(head_w.size) * 2
                      + (STEM_CH + EFNET_IN_FEATURES) * 4 + B * EFNET_IN_FEATURES * 4)

    # ---- kernel 1: backbone + global average pool ------------------------------
    feat3 = pl.pallas_call(
        functools.partial(backbone_pool_kernel,
                          positions=P, tile_p=tile_p, ragged=ragged),
        out_shape=jax.ShapeDtypeStruct((B, 1, EFNET_IN_FEATURES), jnp.float32),
        grid_spec=pltpu.PrefetchScalarGridSpec(
            num_scalar_prefetch=0,
            grid=(B, num_tiles),
            in_specs=[
                # row-tiled patches: the only big, pipelined input
                pl.BlockSpec((1, tile_p, K_PAD), lambda b, t: (b, t, 0)),
                _const_spec(stem_w.shape),
                _const_spec(params["stem_bias"].shape),
                _const_spec(head_w.shape),
                _const_spec(params["head_bias"].shape),
            ],
            # per-batch-row resident pool accumulator (written back once per b)
            out_specs=pl.BlockSpec((1, 1, EFNET_IN_FEATURES), lambda b, t: (b, 0, 0)),
        ),
        compiler_params=pltpu.CompilerParams(
            dimension_semantics=("parallel", "arbitrary"),   # batch across v7x TCs
            vmem_limit_bytes=vmem_limit),
        cost_estimate=pl.CostEstimate(flops=flops,
                                      transcendentals=transcendentals,
                                      bytes_accessed=bytes_accessed),
    )(patches, stem_w, params["stem_bias"], head_w, params["head_bias"])

    feat = feat3.reshape(B, EFNET_IN_FEATURES)               # ~5 KB/row HBM round trip

    # ---- kernel 2: fused meta-MLP + final_fc (tiny, whole arrays in VMEM) ------
    vmem_spec = pl.BlockSpec(memory_space=pltpu.MemorySpace.VMEM)
    out = pl.pallas_call(
        head_mlp_kernel,
        out_shape=jax.ShapeDtypeStruct((B, 1), jnp.float32),
        in_specs=[vmem_spec] * 11,
        out_specs=vmem_spec,
    )(feat, meta_f32, params["w1"], params["b1"], w2f, b2f,
      params["w3a"], params["w3b"], params["b3"], params["w4"], params["b4"])
    return out


def efnet_reference(params, x_nchw, meta):
    """Pure-JAX oracle using the same bf16 casts/folds as the kernels."""
    x = jnp.transpose(x_nchw, (0, 2, 3, 1)).astype(jnp.float32)
    patches, _, _ = im2col_nhwc_bf16(x)
    stem_w, head_w, w2f, b2f = _fold_params(params)
    stem = _silu(jnp.einsum("bpk,kc->bpc", patches, stem_w,
                            preferred_element_type=jnp.float32) + params["stem_bias"])
    y = _silu(jnp.einsum("bpc,cd->bpd", stem.astype(jnp.bfloat16), head_w,
                         preferred_element_type=jnp.float32) + params["head_bias"])
    feat = jnp.mean(y, axis=1)
    m = meta.astype(jnp.float32)
    h1 = jnp.maximum(m @ params["w1"] + params["b1"], 0.0)
    h2 = jnp.maximum(h1 @ w2f + b2f, 0.0)
    h3 = jnp.maximum(feat @ params["w3a"] + h2 @ params["w3b"] + params["b3"], 0.0)
    return h3 @ params["w4"] + params["b4"]


if __name__ == "__main__":
    key = jax.random.PRNGKey(0)
    k_par, k_img, k_meta = jax.random.split(key, 3)

    params = init_params(k_par)
    x = jax.random.normal(k_img, (2, 3, 16, 16), jnp.float32)        # NCHW image batch
    meta = jax.random.normal(k_meta, (2, META_LEN), jnp.float32)     # metadata ensemble

    # Default tiling: tile_p divides P (=64) -> single tile/image, no tail mask.
    out = efnet_forward(params, x, meta)
    # tile_p=48 forces a ragged tail (P=64 -> padded 96, 2 tiles/image) so the
    # multi-tile accumulation + gated tail-mask paths are exercised at toy size.
    out_ragged = efnet_forward(params, x, meta, tile_p=48)
    out, out_ragged = jax.block_until_ready((out, out_ragged))

    assert out.shape == (2, 1) and out.dtype == jnp.float32
    ref = efnet_reference(params, x, meta)
    assert jnp.allclose(out, ref, rtol=2e-2, atol=2e-2)
    assert jnp.allclose(out_ragged, out, rtol=1e-3, atol=1e-3)
    print("KERNEL_OK")
</pallas_src>

<mosaic_0001>
module attributes {stable_mosaic.version = 11 : i64} {
  func.func @backbone_pool_kernel(%arg0: i32, %arg1: i32, %arg2: memref<1x64x32xbf16, #tpu.memory_space<vmem>>, %arg3: memref<32x32xbf16, #tpu.memory_space<vmem>>, %arg4: memref<1x32xf32, #tpu.memory_space<vmem>>, %arg5: memref<32x1280xbf16, #tpu.memory_space<vmem>>, %arg6: memref<1x1280xf32, #tpu.memory_space<vmem>>, %arg7: memref<1x1x1280xf32, #tpu.memory_space<vmem>>) attributes {dimension_semantics = [#tpu.dimension_semantics<parallel>, #tpu.dimension_semantics<arbitrary>], iteration_bounds = array<i64: 2, 1>, scalar_prefetch = 0 : i64, scratch_operands = 0 : i64, tpu.core_type = #tpu.core_type<tc>, window_params = [{transform_indices = @transform_0, window_bounds = array<i64: 1, 64, 32>}, {pipeline_mode = #tpu.pipeline_mode<synchronous>, transform_indices = @transform_1, window_bounds = array<i64: 32, 32>}, {pipeline_mode = #tpu.pipeline_mode<synchronous>, transform_indices = @transform_2, window_bounds = array<i64: 1, 32>}, {pipeline_mode = #tpu.pipeline_mode<synchronous>, transform_indices = @transform_3, window_bounds = array<i64: 32, 1280>}, {pipeline_mode = #tpu.pipeline_mode<synchronous>, transform_indices = @transform_4, window_bounds = array<i64: 1, 1280>}, {transform_indices = @transform_5, window_bounds = array<i64: 1, 1, 1280>}]} {
    %c0_i32 = arith.constant 0 : i32
    %0 = arith.cmpi eq, %arg1, %c0_i32 : i32
    %1 = arith.extui %0 : i1 to i32
    %c0_i32_0 = arith.constant 0 : i32
    %2 = arith.cmpi ne, %1, %c0_i32_0 : i32
    scf.if %2 {
      %cst_27 = arith.constant 0.000000e+00 : f32
      %43 = vector.broadcast %cst_27 : f32 to vector<1x1x1280xf32>
      %c0_28 = arith.constant 0 : index
      %c0_29 = arith.constant 0 : index
      %c0_30 = arith.constant 0 : index
      %44 = vector.load %arg7[%c0_28, %c0_29, %c0_30] : memref<1x1x1280xf32, #tpu.memory_space<vmem>>, vector<1x1x1280xf32>
      tpu.vector_store %arg7[%c0_28, %c0_29, %c0_30], %43 {strides = array<i32>} : memref<1x1x1280xf32, #tpu.memory_space<vmem>>, vector<1x1x1280xf32>,
    } else {
    }
    %c0 = arith.constant 0 : index
    %c0_1 = arith.constant 0 : index
    %c0_2 = arith.constant 0 : index
    %3 = vector.load %arg2[%c0, %c0_1, %c0_2] : memref<1x64x32xbf16, #tpu.memory_space<vmem>>, vector<1x64x32xbf16>
    %4 = vector.shape_cast %3 : vector<1x64x32xbf16> to vector<64x32xbf16>
    %c0_3 = arith.constant 0 : index
    %c0_4 = arith.constant 0 : index
    %5 = vector.load %arg3[%c0_3, %c0_4] : memref<32x32xbf16, #tpu.memory_space<vmem>>, vector<32x32xbf16>
    %cst = arith.constant dense<0.000000e+00> : vector<64x32xf32>
    %6 = tpu.matmul %4, %5, %cst {dimension_numbers = #tpu.dot_dimension_numbers<[1], [0], [0], [1], [0, 0, 1, 1], [], []>} : vector<64x32xbf16>, vector<32x32xbf16>, vector<64x32xf32> -> vector<64x32xf32>
    %c0_5 = arith.constant 0 : index
    %c0_6 = arith.constant 0 : index
    %7 = vector.load %arg4[%c0_5, %c0_6] : memref<1x32xf32, #tpu.memory_space<vmem>>, vector<1x32xf32>
    %8 = vector.broadcast %7 : vector<1x32xf32> to vector<64x32xf32>
    %9 = arith.addf %6, %8 : vector<64x32xf32>
    %cst_7 = arith.constant 5.000000e-01 : f32
    %10 = vector.broadcast %cst_7 : f32 to vector<64x32xf32>
    %11 = arith.mulf %9, %10 : vector<64x32xf32>
    %12 = math.tanh %11 : vector<64x32xf32>
    %cst_8 = arith.constant 5.000000e-01 : f32
    %13 = vector.broadcast %cst_8 : f32 to vector<64x32xf32>
    %14 = arith.mulf %13, %12 : vector<64x32xf32>
    %cst_9 = arith.constant 5.000000e-01 : f32
    %15 = vector.broadcast %cst_9 : f32 to vector<64x32xf32>
    %16 = arith.addf %14, %15 : vector<64x32xf32>
    %17 = arith.mulf %9, %16 : vector<64x32xf32>
    %18 = arith.truncf %17 : vector<64x32xf32> to vector<64x32xbf16>
    %c0_10 = arith.constant 0 : index
    %c0_11 = arith.constant 0 : index
    %19 = vector.load %arg5[%c0_10, %c0_11] : memref<32x1280xbf16, #tpu.memory_space<vmem>>, vector<32x1280xbf16>
    %cst_12 = arith.constant dense<0.000000e+00> : vector<64x1280xf32>
    %20 = tpu.matmul %18, %19, %cst_12 {dimension_numbers = #tpu.dot_dimension_numbers<[1], [0], [0], [1], [0, 0, 1, 1], [], []>} : vector<64x32xbf16>, vector<32x1280xbf16>, vector<64x1280xf32> -> vector<64x1280xf32>
    %c0_13 = arith.constant 0 : index
    %c0_14 = arith.constant 0 : index
    %21 = vector.load %arg6[%c0_13, %c0_14] : memref<1x1280xf32, #tpu.memory_space<vmem>>, vector<1x1280xf32>
    %22 = vector.broadcast %21 : vector<1x1280xf32> to vector<64x1280xf32>
    %23 = arith.addf %20, %22 : vector<64x1280xf32>
    %cst_15 = arith.constant 5.000000e-01 : f32
    %24 = vector.broadcast %cst_15 : f32 to vector<64x1280xf32>
    %25 = arith.mulf %23, %24 : vector<64x1280xf32>
    %26 = math.tanh %25 : vector<64x1280xf32>
    %cst_16 = arith.constant 5.000000e-01 : f32
    %27 = vector.broadcast %cst_16 : f32 to vector<64x1280xf32>
    %28 = arith.mulf %27, %26 : vector<64x1280xf32>
    %cst_17 = arith.constant 5.000000e-01 : f32
    %29 = vector.broadcast %cst_17 : f32 to vector<64x1280xf32>
    %30 = arith.addf %28, %29 : vector<64x1280xf32>
    %31 = arith.mulf %23, %30 : vector<64x1280xf32>
    %c0_18 = arith.constant 0 : index
    %c0_19 = arith.constant 0 : index
    %c0_20 = arith.constant 0 : index
    %32 = vector.load %arg7[%c0_18, %c0_19, %c0_20] : memref<1x1x1280xf32, #tpu.memory_space<vmem>>, vector<1x1x1280xf32>
    %33 = vector.shape_cast %32 : vector<1x1x1280xf32> to vector<1x1280xf32>
    %cst_21 = arith.constant dense<0.000000e+00> : vector<1280xf32>
    %34 = vector.multi_reduction <add>, %31, %cst_21 [0] : vector<64x1280xf32> to vector<1280xf32>
    %35 = vector.shape_cast %34 : vector<1280xf32> to vector<1x1280xf32>
    %36 = arith.addf %33, %35 : vector<1x1280xf32>
    %c0_22 = arith.constant 0 : index
    %c0_23 = arith.constant 0 : index
    %c0_24 = arith.constant 0 : index
    %37 = vector.load %arg7[%c0_22, %c0_23, %c0_24] : memref<1x1x1280xf32, #tpu.memory_space<vmem>>, vector<1x1x1280xf32>
    %38 = vector.shape_cast %37 : vector<1x1x1280xf32> to vector<1x1280xf32>
    %39 = vector.shape_cast %36 : vector<1x1280xf32> to vector<1x1x1280xf32>
    tpu.vector_store %arg7[%c0_22, %c0_23, %c0_24], %39 {strides = array<i32>} : memref<1x1x1280xf32, #tpu.memory_space<vmem>>, vector<1x1x1280xf32>,
    %c0_i32_25 = arith.constant 0 : i32
    %40 = arith.cmpi eq, %arg1, %c0_i32_25 : i32
    %41 = arith.extui %40 : i1 to i32
    %c0_i32_26 = arith.constant 0 : i32
    %42 = arith.cmpi ne, %41, %c0_i32_26 : i32
    scf.if %42 {
      %c0_27 = arith.constant 0 : index
      %c0_28 = arith.constant 0 : index
      %c0_29 = arith.constant 0 : index
      %43 = vector.load %arg7[%c0_27, %c0_28, %c0_29] : memref<1x1x1280xf32, #tpu.memory_space<vmem>>, vector<1x1x1280xf32>
      %cst_30 = arith.constant 1.562500e-02 : f32
      %44 = vector.broadcast %cst_30 : f32 to vector<1x1x1280xf32>
      %45 = arith.mulf %43, %44 : vector<1x1x1280xf32>
      %c0_31 = arith.constant 0 : index
      %c0_32 = arith.constant 0 : index
      %c0_33 = arith.constant 0 : index
      %46 = vector.load %arg7[%c0_31, %c0_32, %c0_33] : memref<1x1x1280xf32, #tpu.memory_space<vmem>>, vector<1x1x1280xf32>
      tpu.vector_store %arg7[%c0_31, %c0_32, %c0_33], %45 {strides = array<i32>} : memref<1x1x1280xf32, #tpu.memory_space<vmem>>, vector<1x1x1280xf32>,
    } else {
    }
    return
  }
  func.func @transform_0(%arg0: i32, %arg1: i32) -> (i32, i32, i32) {
    %c0_i32 = arith.constant 0 : i32
    %c0_i32_0 = arith.constant 0 : i32
    return %arg0, %arg1, %c0_i32 : i32, i32, i32
  }
  func.func @transform_1(%arg0: i32, %arg1: i32) -> (i32, i32) {
    %c0_i32 = arith.constant 0 : i32
    %c0_i32_0 = arith.constant 0 : i32
    %c0_i32_1 = arith.constant 0 : i32
    return %c0_i32, %c0_i32_0 : i32, i32
  }
  func.func @transform_2(%arg0: i32, %arg1: i32) -> (i32, i32) {
    %c0_i32 = arith.constant 0 : i32
    %c0_i32_0 = arith.constant 0 : i32
    %c0_i32_1 = arith.constant 0 : i32
    return %c0_i32, %c0_i32_0 : i32, i32
  }
  func.func @transform_3(%arg0: i32, %arg1: i32) -> (i32, i32) {
    %c0_i32 = arith.constant 0 : i32
    %c0_i32_0 = arith.constant 0 : i32
    %c0_i32_1 = arith.constant 0 : i32
    return %c0_i32, %c0_i32_0 : i32, i32
  }
  func.func @transform_4(%arg0: i32, %arg1: i32) -> (i32, i32) {
    %c0_i32 = arith.constant 0 : i32
    %c0_i32_0 = arith.constant 0 : i32
    %c0_i32_1 = arith.constant 0 : i32
    return %c0_i32, %c0_i32_0 : i32, i32
  }
  func.func @transform_5(%arg0: i32, %arg1: i32) -> (i32, i32, i32) {
    %c0_i32 = arith.constant 0 : i32
    %c0_i32_0 = arith.constant 0 : i32
    %c0_i32_1 = arith.constant 0 : i32
    return %arg0, %c0_i32, %c0_i32_0 : i32, i32, i32
  }
}

module attributes {stable_mosaic.version = 11 : i64} {
  func.func @head_mlp_kernel(%arg0: memref<2x1280xf32, #tpu.memory_space<vmem>>, %arg1: memref<2x24xf32, #tpu.memory_space<vmem>>, %arg2: memref<24x512xf32, #tpu.memory_space<vmem>>, %arg3: memref<1x512xf32, #tpu.memory_space<vmem>>, %arg4: memref<512x256xf32, #tpu.memory_space<vmem>>, %arg5: memref<1x256xf32, #tpu.memory_space<vmem>>, %arg6: memref<1280x128xf32, #tpu.memory_space<vmem>>, %arg7: memref<256x128xf32, #tpu.memory_space<vmem>>, %arg8: memref<1x128xf32, #tpu.memory_space<vmem>>, %arg9: memref<128x1xf32, #tpu.memory_space<vmem>>, %arg10: memref<1x1xf32, #tpu.memory_space<vmem>>, %arg11: memref<2x1xf32, #tpu.memory_space<vmem>>) attributes {dimension_semantics = [], scalar_prefetch = 0 : i64, scratch_operands = 0 : i64, tpu.core_type = #tpu.core_type<tc>} {
    %c0 = arith.constant 0 : index
    %c0_0 = arith.constant 0 : index
    %0 = vector.load %arg0[%c0, %c0_0] : memref<2x1280xf32, #tpu.memory_space<vmem>>, vector<2x1280xf32>
    %c0_1 = arith.constant 0 : index
    %c0_2 = arith.constant 0 : index
    %1 = vector.load %arg1[%c0_1, %c0_2] : memref<2x24xf32, #tpu.memory_space<vmem>>, vector<2x24xf32>
    %c0_3 = arith.constant 0 : index
    %c0_4 = arith.constant 0 : index
    %2 = vector.load %arg2[%c0_3, %c0_4] : memref<24x512xf32, #tpu.memory_space<vmem>>, vector<24x512xf32>
    %cst = arith.constant dense<0.000000e+00> : vector<2x512xf32>
    %3 = tpu.matmul %1, %2, %cst {dimension_numbers = #tpu.dot_dimension_numbers<[1], [0], [0], [1], [0, 0, 1, 1], [], []>} : vector<2x24xf32>, vector<24x512xf32>, vector<2x512xf32> -> vector<2x512xf32>
    %c0_5 = arith.constant 0 : index
    %c0_6 = arith.constant 0 : index
    %4 = vector.load %arg3[%c0_5, %c0_6] : memref<1x512xf32, #tpu.memory_space<vmem>>, vector<1x512xf32>
    %5 = vector.broadcast %4 : vector<1x512xf32> to vector<2x512xf32>
    %6 = arith.addf %3, %5 : vector<2x512xf32>
    %cst_7 = arith.constant 0.000000e+00 : f32
    %7 = vector.broadcast %cst_7 : f32 to vector<2x512xf32>
    %8 = arith.maximumf %6, %7 : vector<2x512xf32>
    %c0_8 = arith.constant 0 : index
    %c0_9 = arith.constant 0 : index
    %9 = vector.load %arg4[%c0_8, %c0_9] : memref<512x256xf32, #tpu.memory_space<vmem>>, vector<512x256xf32>
    %cst_10 = arith.constant dense<0.000000e+00> : vector<2x256xf32>
    %10 = tpu.matmul %8, %9, %cst_10 {dimension_numbers = #tpu.dot_dimension_numbers<[1], [0], [0], [1], [0, 0, 1, 1], [], []>} : vector<2x512xf32>, vector<512x256xf32>, vector<2x256xf32> -> vector<2x256xf32>
    %c0_11 = arith.constant 0 : index
    %c0_12 = arith.constant 0 : index
    %11 = vector.load %arg5[%c0_11, %c0_12] : memref<1x256xf32, #tpu.memory_space<vmem>>, vector<1x256xf32>
    %12 = vector.broadcast %11 : vector<1x256xf32> to vector<2x256xf32>
    %13 = arith.addf %10, %12 : vector<2x256xf32>
    %cst_13 = arith.constant 0.000000e+00 : f32
    %14 = vector.broadcast %cst_13 : f32 to vector<2x256xf32>
    %15 = arith.maximumf %13, %14 : vector<2x256xf32>
    %c0_14 = arith.constant 0 : index
    %c0_15 = arith.constant 0 : index
    %16 = vector.load %arg6[%c0_14, %c0_15] : memref<1280x128xf32, #tpu.memory_space<vmem>>, vector<1280x128xf32>
    %cst_16 = arith.constant dense<0.000000e+00> : vector<2x128xf32>
    %17 = tpu.matmul %0, %16, %cst_16 {dimension_numbers = #tpu.dot_dimension_numbers<[1], [0], [0], [1], [0, 0, 1, 1], [], []>} : vector<2x1280xf32>, vector<1280x128xf32>, vector<2x128xf32> -> vector<2x128xf32>
    %c0_17 = arith.constant 0 : index
    %c0_18 = arith.constant 0 : index
    %18 = vector.load %arg7[%c0_17, %c0_18] : memref<256x128xf32, #tpu.memory_space<vmem>>, vector<256x128xf32>
    %cst_19 = arith.constant dense<0.000000e+00> : vector<2x128xf32>
    %19 = tpu.matmul %15, %18, %cst_19 {dimension_numbers = #tpu.dot_dimension_numbers<[1], [0], [0], [1], [0, 0, 1, 1], [], []>} : vector<2x256xf32>, vector<256x128xf32>, vector<2x128xf32> -> vector<2x128xf32>
    %20 = arith.addf %17, %19 : vector<2x128xf32>
    %c0_20 = arith.constant 0 : index
    %c0_21 = arith.constant 0 : index
    %21 = vector.load %arg8[%c0_20, %c0_21] : memref<1x128xf32, #tpu.memory_space<vmem>>, vector<1x128xf32>
    %22 = vector.broadcast %21 : vector<1x128xf32> to vector<2x128xf32>
    %23 = arith.addf %20, %22 : vector<2x128xf32>
    %cst_22 = arith.constant 0.000000e+00 : f32
    %24 = vector.broadcast %cst_22 : f32 to vector<2x128xf32>
    %25 = arith.maximumf %23, %24 : vector<2x128xf32>
    %c0_23 = arith.constant 0 : index
    %c0_24 = arith.constant 0 : index
    %26 = vector.load %arg9[%c0_23, %c0_24] : memref<128x1xf32, #tpu.memory_space<vmem>>, vector<128x1xf32>
    %cst_25 = arith.constant dense<0.000000e+00> : vector<2x1xf32>
    %27 = tpu.matmul %25, %26, %cst_25 {dimension_numbers = #tpu.dot_dimension_numbers<[1], [0], [0], [1], [0, 0, 1, 1], [], []>} : vector<2x128xf32>, vector<128x1xf32>, vector<2x1xf32> -> vector<2x1xf32>
    %c0_26 = arith.constant 0 : index
    %c0_27 = arith.constant 0 : index
    %28 = vector.load %arg10[%c0_26, %c0_27] : memref<1x1xf32, #tpu.memory_space<vmem>>, vector<1x1xf32>
    %29 = vector.broadcast %28 : vector<1x1xf32> to vector<2x1xf32>
    %30 = arith.addf %27, %29 : vector<2x1xf32>
    %c0_28 = arith.constant 0 : index
    %c0_29 = arith.constant 0 : index
    %31 = vector.load %arg11[%c0_28, %c0_29] : memref<2x1xf32, #tpu.memory_space<vmem>>, vector<2x1xf32>
    tpu.vector_store %arg11[%c0_28, %c0_29], %30 {strides = array<i32>} : memref<2x1xf32, #tpu.memory_space<vmem>>, vector<2x1xf32>,
    return
  }
}

</mosaic_0001>

<bundles_post_ra>
// kernel: efnet_forward.2
= control target key start
LH: loop header
LB: loop body
LE: loop exit
PB: predicated region body
PF: predicated region fallthrough
CT: control target
= control target key end

     0   :  { %s2058_s18 = smov 0   ;;  %s2060_s19 = smov 0   ;;  %s2898_s0 = inlined_call_operand.vmem [shape: bf16[2,64,32], index: 0, kind: input, shape index: {}]   ;;  %s2899_s1 = inlined_call_operand.vmem [shape: bf16[32,32], index: 1, kind: input, shape index: {}]   ;;  %s2900_s2 = inlined_call_operand.vmem [shape: f32[1,32], index: 2, kind: input, shape index: {}]   ;;  %s2901_s3 = inlined_call_operand.vmem [shape: bf16[32,1280], index: 3, kind: input, shape index: {}]   ;;  %s2902_s4 = inlined_call_operand.vmem [shape: f32[1,1280], index: 4, kind: input, shape index: {}]   ;;  %s2903_s5 = inlined_call_operand.vmem [shape: f32[2,1,1280], index: 5, kind: output, shape index: {}]  }
   0x1   :  { %s2062_s20 = smov 0  }
   0x2 LB: > { %s27_s21 = sadd.s32 1, %s2019_s19  ;;  %p1682_p0 = scmp.ge.s32.totalorder %s2023_s20, 1  ;;  %s2023_s20 = sphi %s2062_s20, %s15_s20   ;;  %s2019_s19 = sphi %s2060_s19, %s2931_s19   ;;  %s2015_s18 = sphi %s2058_s18, %s2930_s18  }
   0x3   : > { %p29_p1 = scmp.ge.s32.totalorder %s27_s21, 2  ;;  %p206_p2 = scmp.lt.s32.totalorder %s2023_s20, 3 }
   0x5   : > { %s2933_s21 = smov (%p29_p1, %s27_s21), 0  ;;  %p207_p3 = pnand %p1682_p0, %p206_p2 }
   0x7   : > { %210 = sbr.rel (%p207_p3) target bundleno = 632 (0x278), region = 40 }
   0xc   : > { %v1789_v0 = vld [vmem:[%s2899_s1 + $0x8] sm:$0xff]   ;;  %p238_p4 = scmp.lt.s32.totalorder %s2015_s18, 1  ;;  %v1790_v1 = vld [vmem:[%s2899_s1] sm:$0xff]   ;;  %vm313_vm0 = vcmask 261120   ;;  %v1795_v6 = vld [vmem:[%s2901_s3 + $0x54] ss:$40 sps:$4 sm:$0xff]  }
   0xd   : > { %1745 = vmatprep.subr.bf16.mxu0 %v1789_v0  ;;  %v1797_v7 = vld [vmem:[%s2901_s3 + $0x50] ss:$40 sps:$4 sm:$0xff]   ;;  %1757 = vmatprep.subr.bf16.mxu1 %v1795_v6  ;;  %v1798_v8 = vld [vmem:[%s2901_s3 + $0x4] ss:$40 sps:$4 sm:$0xff]   ;;  %v1800_v9 = vld [vmem:[%s2901_s3] ss:$40 sps:$4 sm:$0xff]  }
   0xe   : > { %s2935_s18 = smov (!%p238_p4, %s2015_s18), 1  ;;  %1746 = vmatpush3.bf16.msra.mxu0 %v1789_v0  ;;  %1759 = vmatpush1.bf16.msra.mxu1 %v1797_v7  ;;  %v2025_v10 = vmov 0   ;;  %v1806_v11 = vld [vmem:[%s2901_s3 + $0x5c] ss:$40 sps:$4 sm:$0xff]   ;;  %v1685_v13 = vld [vmem:[%s2900_s2] ss:$0 sm:$0xff] }
   0xf   : > { %1747 = vmatprep.subr.bf16.mxu0 %v1790_v1  ;;  %s1738_s26 = sshll.u32 %s2935_s18, 5  ;;  %1758 = vmatprep.subr.bf16.mxu1 %v1798_v8  ;;  %v1803_v12 = vld [vmem:[%s2901_s3 + $0x64] ss:$40 sps:$4 sm:$0xff]   ;;  %v1801_v53 = vld [vmem:[%s2901_s3 + $0x60] ss:$40 sps:$4 sm:$0xff]   ;;  %s1761_s9 = smul.u32 10, %s2935_s18 }
  0x10   : > { %s245_s29 = scalar_lea.vmem %s2898_s0, %s1738_s26  ;;  %663 = vmatprep.mubr.bf16.mxu1 %v2025_v10  ;;  %v1812_v58 = vld [vmem:[%s2901_s3 + $0x14] ss:$40 sps:$4 sm:$0xff]   ;;  %v1804_v59 = vld [vmem:[%s2901_s3 + $0x58] ss:$40 sps:$4 sm:$0xff]  }
  0x11   : > { %v1791_v2 = vld [vmem:[%s245_s29] sm:$0xff]   ;;  %v1792_v3 = vld [vmem:[%s245_s29 + $0x8] sm:$0xff]   ;;  %v1793_v4 = vld [vmem:[%s245_s29 + $0x10] sm:$0xff]   ;;  %s2800_s11 = scalar_lea.vmem %s2903_s5, %s1761_s9 }
  0x12   : > { %1748 = vmatpush3.bf16.msra.mxu0 %v1790_v1  ;;  %1749 = vmatprep.mubr.msk.bf16.mxu0 %vm313_vm0, %v1791_v2  ;;  %v1794_v5 = vld [vmem:[%s245_s29 + $0x18] sm:$0xff]   ;;  %v1809_v62 = vld [vmem:[%s2901_s3 + $0xc] ss:$40 sps:$4 sm:$0xff]  }
  0x13   : > { %633 = vmatprep.subr.bf16.mxu0 %v1795_v6  ;;  %1760 = vmatpush1.bf16.msra.mxu1 %v1800_v9  ;;  %v1810_v0 = vld [vmem:[%s2901_s3 + $0x10] ss:$40 sps:$4 sm:$0xff]  }
  0x14   : > { %779 = vmatprep.subr.bf16.mxu1 %v1803_v12 }
  0x15   : > { %1750 = vmatmul.mubr.msk.bf16.vlgmr.msra.gmra.mxu0 %vm313_vm0, %v1792_v3  ;;  %v1818_v3 = vld [vmem:[%s2901_s3 + $0x74] ss:$40 sps:$4 sm:$0xff]  }
  0x16   : > { %1753 = vmatprep.mubr.msk.bf16.mxu0 %vm313_vm0, %v1793_v4  ;;  %634 = vmatpush1.bf16.msra.mxu0 %v1797_v7 }
  0x17   : > { %635 = vmatprep.subr.bf16.mxu0 %v1798_v8  ;;  %v1815_v8 = vld [vmem:[%s2901_s3 + $0x6c] ss:$40 sps:$4 sm:$0xff]  }
  0x1a   : > { %636 = vmatpush1.bf16.msra.mxu0 %v1800_v9 }
  0x1b   : > { %706 = vmatprep.subr.bf16.mxu0 %v1806_v11 }
  0x1d   : > { %1754 = vmatmul.mubr.msk.bf16.gmra.mxu0 %vm313_vm0, %v1794_v5  ;;  %v1807_v5 = vld [vmem:[%s2901_s3 + $0x8] ss:$40 sps:$4 sm:$0xff]  }
  0x1e   : > { %653 = vmatprep.mubr.bf16.mxu0 %v2025_v10 }
  0xd5   : > { %v1751_v14 = vpop.f32.mrf.mxu0 }
  0xd6   : > { %v369_v15 = vadd.f32 %v1751_v14, %v1685_v13 }
  0xd7   : > { %v360_v16 = vpop.f32.mrf.mxu0 }
  0xd8   : > { %v393_v17 = vmul.f32 0.5, %v369_v15  ;;  %v361_v18 = vadd.f32 %v1685_v13, %v360_v16  ;;  %v1821_v16 = vld [vmem:[%s2901_s3 + $0x1c] ss:$40 sps:$4 sm:$0xff]  }
  0xd9   : > { %v1752_v19 = vpop.f32.mrf.mxu0 }
  0xda   : > { %1825 = vtanh.f32 %v393_v17  ;;  %v391_v20 = vmul.f32 0.5, %v361_v18  ;;  %v372_v21 = vadd.f32 %v1752_v19, %v1685_v13  ;;  %v1819_v19 = vld [vmem:[%s2901_s3 + $0x18] ss:$40 sps:$4 sm:$0xff]  }
  0xdb   : > { %v363_v22 = vpop.f32.mrf.mxu0 }
  0xdc   : > { %1827 = vtanh.f32 %v391_v20  ;;  %v394_v23 = vmul.f32 0.5, %v372_v21  ;;  %v364_v24 = vadd.f32 %v1685_v13, %v363_v22  ;;  %v1816_v22 = vld [vmem:[%s2901_s3 + $0x70] ss:$40 sps:$4 sm:$0xff]  }
  0xdd   : > { %v1755_v25 = vpop.f32.mrf.mxu0 }
  0xde   : > { %1829 = vtanh.f32 %v394_v23  ;;  %v392_v26 = vmul.f32 0.5, %v364_v24  ;;  %v2115_v30 = vadd.f32 %v1755_v25, %v1685_v13  ;;  %v1824_v23 = vld [vmem:[%s2901_s3 + $0x24] ss:$40 sps:$4 sm:$0xff]   ;;  %v2904_v25 = vlaneseq }
  0xdf   : > { %v376_v27 = vpop.f32.mrf.mxu0 }
  0xe0   : > { %1831 = vtanh.f32 %v392_v26  ;;  %v377_v28 = vadd.f32 %v1685_v13, %v376_v27  ;;  %v397_v36 = vmul.f32 0.5, %v2115_v30  ;;  %v2218_v26 = vshrl.u32 %v2904_v25, 7 }
  0xe1   : > { %v1756_v29 = vpop.f32.mrf.mxu0 }
  0xe2   : > { %v395_v31 = vmul.f32 0.5, %v377_v28  ;;  %v2117_v32 = vadd.f32 %v1756_v29, %v1685_v13  ;;  %v2906_v27 = vsub.s32 0, %v2218_v26  ;;  %v2905_v29 = vsub.s32 1, %v2218_v26 }
  0xe3   : > { %v379_v33 = vpop.f32.mrf.mxu0 }
  0xe4   : > { %1833 = vtanh.f32 %v395_v31  ;;  %v398_v34 = vmul.f32 0.5, %v2117_v32  ;;  %v380_v35 = vadd.f32 %v1685_v13, %v379_v33 }
  0xe6   : > { %v396_v37 = vmul.f32 0.5, %v380_v35  ;;  %1835 = vtanh.f32 %v398_v34 }
  0xe7   : > { %v1826_v38 = vpop.eup %1825 }
  0xe8   : > { %v409_v39 = vmul.f32 0.5, %v1826_v38  ;;  %1837 = vtanh.f32 %v396_v37 }
  0xe9   : > { %v1828_v40 = vpop.eup %1827  ;;  %1839 = vtanh.f32 %v397_v36 }
  0xea   : > { %v407_v41 = vmul.f32 0.5, %v1828_v40  ;;  %v417_v43 = vadd.f32 0.5, %v409_v39 }
  0xeb   : > { %v1830_v42 = vpop.eup %1829 }
  0xec   : > { %v410_v44 = vmul.f32 0.5, %v1830_v42  ;;  %v415_v46 = vadd.f32 0.5, %v407_v41  ;;  %v425_v49 = vmul.f32 %v417_v43, %v369_v15  ;;  %v1813_v15 = vld [vmem:[%s2901_s3 + $0x68] ss:$40 sps:$4 sm:$0xff]  }
  0xed   : > { %v1832_v45 = vpop.eup %1831 }
  0xee   : > { %v418_v47 = vadd.f32 0.5, %v410_v44  ;;  %v408_v48 = vmul.f32 0.5, %v1832_v45  ;;  %v423_v54 = vmul.f32 %v415_v46, %v361_v18 }
  0xf0   : > { %v426_v50 = vmul.f32 %v418_v47, %v372_v21  ;;  %v416_v51 = vadd.f32 0.5, %v408_v48  ;;  %v473_v47 = vsub.s32 3, %v2218_v26 }
  0xf1   : > { %v1834_v52 = vpop.eup %1833 }
  0xf2   : > { %v2124_v55 = vpack.c.bf16 %v426_v50, %v425_v49  ;;  %v424_v56 = vmul.f32 %v416_v51, %v364_v24  ;;  %v411_v57 = vmul.f32 0.5, %v1834_v52  ;;  %v1822_v24 = vld [vmem:[%s2901_s3 + $0x20] ss:$40 sps:$4 sm:$0xff]  }
  0xf3   : > { %v1836_v60 = vpop.eup %1835 }
  0xf4   : > { %v2132_v61 = vpack.c.bf16 %v424_v56, %v423_v54  ;;  %1717 = vmatmul.mubr.msk.bf16.vlgmr.msra.gmra.mxu1 %vm313_vm0, %v2124_v55  ;;  %v419_v1 = vadd.f32 0.5, %v411_v57  ;;  %v414_v6 = vmul.f32 0.5, %v1836_v60 }
  0xf5   : > { %v1838_v63 = vpop.eup %1837  ;;  %780 = vmatpush1.bf16.msra.mxu1 %v1801_v53  ;;  %673 = vmatprep.mubr.bf16.mxu1 %v2025_v10 }
  0xf6   : > { %v412_v2 = vmul.f32 0.5, %v1838_v63  ;;  %1716 = vmatmul.mubr.msk.bf16.vlgmr.msra.gmra.mxu0 %vm313_vm0, %v2132_v61  ;;  %781 = vmatprep.subr.bf16.mxu1 %v1812_v58  ;;  %v1840_v4 = vpop.eup %1839  ;;  %v427_v11 = vmul.f32 %v419_v1, %v377_v28  ;;  %v422_v13 = vadd.f32 0.5, %v414_v6  ;;  %v2224_v28 = vld [vmem:[%s2902_s4] sm:$0xff] }
  0xf7   : > { %707 = vmatpush1.bf16.msra.mxu0 %v1804_v59  ;;  %726 = vmatprep.mubr.bf16.mxu0 %v2025_v10  ;;  %v413_v9 = vmul.f32 0.5, %v1840_v4  ;;  %v2235_v31 = vrot.slane %v2224_v28, %v2905_v29  ;;  %v2274_v59 = vrot.slane %v2224_v28, %v473_v47  ;;  %v2379_v29 = vld [vmem:[%s2902_s4 + $0x8] sm:$0x3] }
  0xf8   : > { %v420_v7 = vadd.f32 0.5, %v412_v2  ;;  %708 = vmatprep.subr.bf16.mxu0 %v1809_v62  ;;  %v430_v18 = vmul.f32 %v422_v13, %v2117_v32 }
  0xf9   : > { %782 = vmatpush1.bf16.msra.mxu1 %v1810_v0  ;;  %v421_v17 = vadd.f32 0.5, %v413_v9 }
  0xfa   : > { %v428_v12 = vmul.f32 %v420_v7, %v380_v35  ;;  %925 = vmatprep.subr.bf16.mxu1 %v1818_v3  ;;  %v469_v35 = vsub.s32 2, %v2218_v26 }
  0xfb   : > { %709 = vmatpush1.bf16.msra.mxu0 %v1807_v5  ;;  %v429_v20 = vmul.f32 %v421_v17, %v2115_v30  ;;  %v2230_v30 = vrot.slane %v2224_v28, %v2906_v27 }
  0xfc   : > { %v433_v14 = vpack.c.bf16 %v428_v12, %v427_v11  ;;  %852 = vmatprep.subr.bf16.mxu0 %v1815_v8  ;;  %v2256_v46 = vrot.slane %v2224_v28, %v469_v35 }
  0xfd   : > { %v434_v21 = vpack.c.bf16 %v430_v18, %v429_v20 }
  0xfe   : > { %1718 = vmatmul.mubr.msk.bf16.gmra.mxu1 %vm313_vm0, %v433_v14  ;;  %1720 = vmatmul.mubr.msk.bf16.vlgmr.msra.gmra.mxu0 %vm313_vm0, %v2132_v61 }
  0xff   : > { %683 = vmatprep.mubr.bf16.mxu1 %v2025_v10  ;;  %736 = vmatprep.mubr.bf16.mxu0 %v2025_v10 }
 0x100   : > { %853 = vmatpush1.bf16.msra.mxu0 %v1813_v15 }
 0x101   : > { %854 = vmatprep.subr.bf16.mxu0 %v1821_v16 }
 0x104   : > { %855 = vmatpush1.bf16.msra.mxu0 %v1819_v19 }
 0x106   : > { %1719 = vmatmul.mubr.msk.bf16.gmra.mxu1 %vm313_vm0, %v434_v21  ;;  %1721 = vmatmul.mubr.msk.bf16.gmra.mxu0 %vm313_vm0, %v2124_v55 }
 0x107   : > { %746 = vmatprep.mubr.bf16.mxu0 %v2025_v10  ;;  %799 = vmatprep.mubr.bf16.mxu1 %v2025_v10 }
 0x10e   : > { %1722 = vmatmul.mubr.msk.bf16.gmra.mxu0 %vm313_vm0, %v433_v14  ;;  %1724 = vmatmul.mubr.msk.bf16.vlgmr.msra.gmra.mxu1 %vm313_vm0, %v2132_v61 }
 0x10f   : > { %926 = vmatpush1.bf16.msra.mxu1 %v1816_v22  ;;  %756 = vmatprep.mubr.bf16.mxu0 %v2025_v10  ;;  %v477_v22 = vsub.s32 4, %v2218_v26 }
 0x110   : > { %809 = vmatprep.mubr.bf16.mxu1 %v2025_v10  ;;  %927 = vmatprep.subr.bf16.mxu1 %v1824_v23 }
 0x113   : > { %928 = vmatpush1.bf16.msra.mxu1 %v1822_v24 }
 0x116   : > { %1723 = vmatmul.mubr.msk.bf16.gmra.mxu0 %vm313_vm0, %v434_v21  ;;  %1725 = vmatmul.mubr.msk.bf16.gmra.mxu1 %vm313_vm0, %v2124_v55 }
 0x117   : > { %819 = vmatprep.mubr.bf16.mxu1 %v2025_v10  ;;  %872 = vmatprep.mubr.bf16.mxu0 %v2025_v10 }
 0x11e   : > { %1726 = vmatmul.mubr.msk.bf16.gmra.mxu1 %vm313_vm0, %v433_v14  ;;  %1728 = vmatmul.mubr.msk.bf16.vlgmr.msra.gmra.mxu0 %vm313_vm0, %v2132_v61 }
 0x11f   : > { %829 = vmatprep.mubr.bf16.mxu1 %v2025_v10  ;;  %882 = vmatprep.mubr.bf16.mxu0 %v2025_v10 }
 0x126   : > { %1727 = vmatmul.mubr.msk.bf16.gmra.mxu1 %vm313_vm0, %v434_v21  ;;  %1729 = vmatmul.mubr.msk.bf16.gmra.mxu0 %vm313_vm0, %v2124_v55 }
 0x127   : > { %892 = vmatprep.mubr.bf16.mxu0 %v2025_v10  ;;  %945 = vmatprep.mubr.bf16.mxu1 %v2025_v10 }
 0x12e   : > { %1730 = vmatmul.mubr.msk.bf16.gmra.mxu0 %vm313_vm0, %v433_v14  ;;  %1732 = vmatmul.mubr.msk.bf16.vlgmr.msra.gmra.mxu1 %vm313_vm0, %v2132_v61 }
 0x12f   : > { %902 = vmatprep.mubr.bf16.mxu0 %v2025_v10  ;;  %955 = vmatprep.mubr.bf16.mxu1 %v2025_v10 }
 0x136   : > { %1731 = vmatmul.mubr.msk.bf16.gmra.mxu0 %vm313_vm0, %v434_v21  ;;  %1733 = vmatmul.mubr.msk.bf16.gmra.mxu1 %vm313_vm0, %v2124_v55 }
 0x137   : > { %965 = vmatprep.mubr.bf16.mxu1 %v2025_v10 }
 0x13e   : > { %1734 = vmatmul.mubr.msk.bf16.gmra.mxu1 %vm313_vm0, %v433_v14 }
 0x13f   : > { %975 = vmatprep.mubr.bf16.mxu1 %v2025_v10 }
 0x146   : > { %1735 = vmatmul.mubr.msk.bf16.gmra.mxu1 %vm313_vm0, %v434_v21 }
 0x1b4   : > { %v665_v10 = vpop.f32.mrf.mxu1 }
 0x1b5   : > { %v2238_v32 = vadd.f32 %v665_v10, %v2230_v30 }
 0x1b6   : > { %v655_v33 = vpop.f32.mrf.mxu0  ;;  %v667_v34 = vpop.f32.mrf.mxu1 }
 0x1b7   : > { %v2242_v36 = vadd.f32 %v655_v33, %v2230_v30  ;;  %v2245_v37 = vadd.f32 %v667_v34, %v2235_v31  ;;  %v1006_v40 = vmul.f32 0.5, %v2238_v32 }
 0x1b8   : > { %v657_v38 = vpop.f32.mrf.mxu0  ;;  %v669_v39 = vpop.f32.mrf.mxu1 }
 0x1b9   : > { %v986_v41 = vmul.f32 0.5, %v2242_v36  ;;  %v2250_v42 = vadd.f32 %v657_v38, %v2235_v31  ;;  %v2253_v43 = vadd.f32 %v669_v39, %v2230_v30  ;;  %v1007_v51 = vmul.f32 0.5, %v2245_v37 }
 0x1ba   : > { %v659_v44 = vpop.f32.mrf.mxu0  ;;  %v671_v45 = vpop.f32.mrf.mxu1 }
 0x1bb   : > { %1841 = vtanh.f32 %v986_v41  ;;  %v987_v48 = vmul.f32 0.5, %v2250_v42  ;;  %v2261_v49 = vadd.f32 %v659_v44, %v2230_v30  ;;  %v2264_v50 = vadd.f32 %v671_v45, %v2235_v31 }
 0x1bc   : > { %v661_v52 = vpop.f32.mrf.mxu0  ;;  %1843 = vtanh.f32 %v1006_v40  ;;  %v1016_v55 = vmul.f32 0.5, %v2253_v43  ;;  %v481_v40 = vsub.s32 5, %v2218_v26 }
 0x1bd   : > { %v996_v53 = vmul.f32 0.5, %v2261_v49  ;;  %v2269_v54 = vadd.f32 %v661_v52, %v2235_v31  ;;  %1845 = vtanh.f32 %v987_v48  ;;  %v1017_v56 = vmul.f32 0.5, %v2264_v50 }
 0x1be   : > { %v675_v57 = vpop.f32.mrf.mxu1  ;;  %v728_v58 = vpop.f32.mrf.mxu0  ;;  %v485_v52 = vsub.s32 6, %v2218_v26 }
 0x1bf   : > { %1847 = vtanh.f32 %v996_v53  ;;  %v997_v60 = vmul.f32 0.5, %v2269_v54  ;;  %v2278_v61 = vadd.f32 %v675_v57, %v2230_v30  ;;  %v2281_v62 = vadd.f32 %v728_v58, %v2256_v46 }
 0x1c0   : > { %1849 = vtanh.f32 %v1007_v51  ;;  %v677_v63 = vpop.f32.mrf.mxu1  ;;  %v730_v0 = vpop.f32.mrf.mxu0  ;;  %v2322_v51 = vrot.slane %v2224_v28, %v477_v22  ;;  %v2345_v22 = vrot.slane %v2224_v28, %v485_v52 }
 0x1c1   : > { %1851 = vtanh.f32 %v997_v60  ;;  %v1026_v1 = vmul.f32 0.5, %v2278_v61  ;;  %v988_v2 = vmul.f32 0.5, %v2281_v62  ;;  %v2286_v3 = vadd.f32 %v677_v63, %v2235_v31 }
 0x1c2   : > { %1853 = vtanh.f32 %v1016_v55  ;;  %v2289_v4 = vadd.f32 %v730_v0, %v2274_v59  ;;  %v679_v5 = vpop.f32.mrf.mxu1  ;;  %v732_v6 = vpop.f32.mrf.mxu0  ;;  %v2026_v63 = vmov 1966171168  }
 0x1c3   : > { %1855 = vtanh.f32 %v1017_v56  ;;  %v1027_v7 = vmul.f32 0.5, %v2286_v3  ;;  %v2293_v8 = vadd.f32 %v679_v5, %v2230_v30  ;;  %v2298_v14 = vadd.f32 %v732_v6, %v2256_v46 }
 0x1c4   : > { %1857 = vtanh.f32 %v1026_v1  ;;  %v989_v9 = vmul.f32 0.5, %v2289_v4  ;;  %v681_v11 = vpop.f32.mrf.mxu1  ;;  %v734_v12 = vpop.f32.mrf.mxu0  ;;  %v2326_v0 = vunpack.c.l.s4 %v2026_v63  ;;  %v2333_v5 = vrot.slane %v2224_v28, %v481_v40 }
 0x1c5   : > { %1859 = vtanh.f32 %v988_v2  ;;  %v1036_v13 = vmul.f32 0.5, %v2293_v8  ;;  %v2301_v15 = vadd.f32 %v681_v11, %v2235_v31  ;;  %v998_v23 = vmul.f32 0.5, %v2298_v14 }
 0x1c6   : > { %1861 = vtanh.f32 %v1027_v7  ;;  %v685_v16 = vpop.f32.mrf.mxu1  ;;  %v738_v17 = vpop.f32.mrf.mxu0  ;;  %v2309_v24 = vadd.f32 %v734_v12, %v2274_v59  ;;  %2911 = vst [vmem:[#allocation2_spill] sm:$0xff] %v2326_v0 }
 0x1c7   : > { %1863 = vtanh.f32 %v989_v9  ;;  %v2304_v18 = vadd.f32 %v685_v16, %v2230_v30  ;;  %v1037_v35 = vmul.f32 0.5, %v2301_v15  ;;  %v2337_v16 = vadd.f32 %v738_v17, %v2256_v46 }
 0x1c8   : > { %v1842_v19 = vpop.eup %1841  ;;  %1865 = vtanh.f32 %v1036_v13  ;;  %v687_v20 = vpop.f32.mrf.mxu1  ;;  %v999_v57 = vmul.f32 0.5, %v2309_v24 }
 0x1c9   : > { %v740_v21 = vpop.f32.mrf.mxu0  ;;  %v1046_v10 = vmul.f32 0.5, %v2304_v18  ;;  %v1844_v33 = vpop.eup %1843  ;;  %v1146_v34 = vmul.f32 0.5, %v1842_v19  ;;  %v2315_v44 = vadd.f32 %v687_v20, %v2235_v31 }
 0x1ca   : > { %v689_v38 = vpop.f32.mrf.mxu1  ;;  %v1846_v41 = vpop.eup %1845  ;;  %v1166_v55 = vmul.f32 0.5, %v1844_v33 }
 0x1cb   : > { %v742_v39 = vpop.f32.mrf.mxu0  ;;  %1867 = vtanh.f32 %v1046_v10  ;;  %v1226_v60 = vadd.f32 0.5, %v1146_v34  ;;  %v1147_v7 = vmul.f32 0.5, %v1846_v41  ;;  %v1047_v12 = vmul.f32 0.5, %v2315_v44 }
 0x1cc   : > { %v1848_v45 = vpop.eup %1847  ;;  %v2317_v47 = vpop.f32.mrf.mxu1  ;;  %1869 = vtanh.f32 %v998_v23  ;;  %v2340_v19 = vadd.f32 %v689_v38, %v2230_v30  ;;  %v489_v23 = vsub.s32 7, %v2218_v26  ;;  %v1246_v33 = vadd.f32 0.5, %v1166_v55 }
 0x1cd   : > { %v2319_v48 = vpop.f32.mrf.mxu0  ;;  %v1850_v53 = vpop.eup %1849  ;;  %v1156_v56 = vmul.f32 0.5, %v1848_v45  ;;  %1871 = vtanh.f32 %v1037_v35  ;;  %v1306_v41 = vmul.f32 %v1226_v60, %v2242_v36  ;;  %v2356_v55 = vadd.f32 %v740_v21, %v2274_v59 }
 0x1ce   : > { %v1852_v58 = vpop.eup %1851  ;;  %v2330_v2 = vpop.f32.mrf.mxu1  ;;  %v1167_v34 = vmul.f32 0.5, %v1850_v53  ;;  %1873 = vtanh.f32 %v999_v57  ;;  %v1056_v45 = vmul.f32 0.5, %v2340_v19  ;;  %v2363_v25 = vadd.f32 %v742_v39, %v2256_v46 }
 0x1cf   : > { %v2328_v1 = vpop.f32.mrf.mxu0  ;;  %v1854_v6 = vpop.eup %1853  ;;  %v1236_v9 = vadd.f32 0.5, %v1156_v56  ;;  %v1157_v11 = vmul.f32 0.5, %v1852_v58  ;;  %v1227_v58 = vadd.f32 0.5, %v1147_v7  ;;  %1875 = vtanh.f32 %v1047_v12 }
 0x1d0   : > { %v1856_v13 = vpop.eup %1855  ;;  %v2342_v20 = vpop.f32.mrf.mxu1  ;;  %v1176_v30 = vmul.f32 0.5, %v1854_v6  ;;  %1877 = vtanh.f32 %v1056_v45  ;;  %v2368_v21 = vrot.slane %v2224_v28, %v489_v23  ;;  %v1326_v12 = vmul.f32 %v1246_v33, %v2238_v32 }
 0x1d1   : > { %v1858_v10 = vpop.eup %1857  ;;  %v1316_v35 = vmul.f32 %v1236_v9, %v2261_v49  ;;  %v2349_v40 = vpop.f32.mrf.mxu0  ;;  %v1237_v38 = vadd.f32 0.5, %v1157_v11  ;;  %v1177_v63 = vmul.f32 0.5, %v1856_v13  ;;  %v1008_v11 = vmul.f32 0.5, %v2337_v16 }
 0x1d2   : > { %v1860_v17 = vpop.eup %1859  ;;  %v2353_v56 = vpop.f32.mrf.mxu1  ;;  %v1186_v9 = vmul.f32 0.5, %v1858_v10  ;;  %v1256_v13 = vadd.f32 0.5, %v1176_v30  ;;  %v1009_v39 = vmul.f32 0.5, %v2356_v55 }
 0x1d3   : > { %v1862_v52 = vpop.eup %1861  ;;  %v1388_v57 = vadd.f32 %v1316_v35, %v1306_v41  ;;  %v1148_v6 = vmul.f32 0.5, %v1860_v17  ;;  %v2365_v7 = vpop.f32.mrf.mxu0  ;;  %v1247_v35 = vadd.f32 0.5, %v1167_v34  ;;  %v1317_v10 = vmul.f32 %v1237_v38, %v2269_v54 }
 0x1d4   : > { %v1864_v53 = vpop.eup %1863  ;;  %v2359_v36 = vpop.f32.mrf.mxu1  ;;  %v1307_v17 = vmul.f32 %v1227_v58, %v2250_v42  ;;  %v1187_v45 = vmul.f32 0.5, %v1862_v52  ;;  %v1257_v32 = vadd.f32 0.5, %v1177_v63  ;;  %v1266_v33 = vadd.f32 0.5, %v1186_v9 }
 0x1d5   : > { %v1866_v60 = vpop.eup %1865  ;;  %v1149_v49 = vmul.f32 0.5, %v1864_v53  ;;  %v1389_v23 = vadd.f32 %v1388_v57, %v1326_v12  ;;  %v1228_v54 = vadd.f32 0.5, %v1148_v6  ;;  %1879 = vtanh.f32 %v1008_v11  ;;  %v754_v52 = vpop.f32.mrf.mxu0 }
 0x1d6   : > { %v2372_v41 = vpop.f32.mrf.mxu1  ;;  %v1196_v34 = vmul.f32 0.5, %v1866_v60  ;;  %v1018_v42 = vmul.f32 0.5, %v2363_v25  ;;  %v2386_v38 = vadd.f32 %v2317_v47, %v2235_v31  ;;  %v1336_v53 = vmul.f32 %v1256_v13, %v2253_v43 }
 0x1d7   : > { %v1401_v27 = vadd.f32 %v1317_v10, %v1307_v17  ;;  %v2912_v63 = vsub.s32 0, %v2218_v26  ;;  %v1327_v6 = vmul.f32 %v1247_v35, %v2245_v37  ;;  %v1267_v11 = vadd.f32 0.5, %v1187_v45 }
 0x1d8   : > { %v1868_v28 = vpop.eup %1867  ;;  %v2381_v30 = vpop.f32.mrf.mxu1  ;;  %v1229_v12 = vadd.f32 0.5, %v1149_v49  ;;  %1881 = vtanh.f32 %v1009_v39  ;;  %v1337_v31 = vmul.f32 %v1257_v32, %v2264_v50  ;;  %v1346_v47 = vmul.f32 %v1266_v33, %v2278_v61 }
 0x1d9   : > { %v1870_v58 = vpop.eup %1869  ;;  %v1206_v0 = vmul.f32 0.5, %v1868_v28  ;;  %v2394_v9 = vrot.slane %v2379_v29, %v2912_v63  ;;  %v1390_v43 = vadd.f32 %v1389_v23, %v1336_v53  ;;  %v1276_v13 = vadd.f32 0.5, %v1196_v34 }
 0x1da   : > { %v2389_v57 = vpop.f32.mrf.mxu1  ;;  %v1872_v60 = vpop.eup %1871  ;;  %v2402_v17 = vmul.f32 %v1228_v54, %v2281_v62  ;;  %v1158_v28 = vmul.f32 0.5, %v1870_v58  ;;  %1883 = vtanh.f32 %v1018_v42  ;;  %v1057_v63 = vmul.f32 0.5, %v2386_v38 }
 0x1db   : > { %2913 = vst [vmem:[#allocation3_spill] sm:$0xff] %v2394_v9  ;;  %v758_v9 = vpop.f32.mrf.mxu0  ;;  %v1874_v37 = vpop.eup %1873  ;;  %v1402_v35 = vadd.f32 %v1401_v27, %v1327_v6  ;;  %v1286_v49 = vadd.f32 0.5, %v1206_v0  ;;  %v2407_v50 = vadd.f32 %v2319_v48, %v2274_v59  ;;  %v2411_v61 = vadd.f32 %v2328_v1, %v2256_v46 }
 0x1dc   : > { %v2399_v10 = vpop.f32.mrf.mxu1  ;;  %v1347_v45 = vmul.f32 %v1267_v11, %v2286_v3  ;;  %v2415_v62 = vmul.f32 %v1229_v12, %v2289_v4  ;;  %v1197_v39 = vmul.f32 0.5, %v1872_v60  ;;  %1885 = vtanh.f32 %v1057_v63  ;;  %v1876_v32 = vpop.eup %1875 }
 0x1dd   : > { %v1391_v27 = vadd.f32 %v1390_v43, %v1346_v47  ;;  %v1356_v0 = vmul.f32 %v1276_v13, %v2293_v8  ;;  %v1019_v48 = vmul.f32 0.5, %v2407_v50  ;;  %v1028_v33 = vmul.f32 0.5, %v2411_v61  ;;  %v1878_v34 = vpop.eup %1877  ;;  %v760_v42 = vpop.f32.mrf.mxu0 }
 0x1de   : > { %v2417_v23 = vpop.f32.mrf.mxu1  ;;  %v2422_v1 = vadd.f32 0.5, %v1158_v28  ;;  %v1159_v54 = vmul.f32 0.5, %v1874_v37  ;;  %v2426_v3 = vadd.f32 %v2330_v2, %v2322_v51  ;;  %v2430_v4 = vadd.f32 %v2349_v40, %v2274_v59 }
 0x1df   : > { %v1366_v58 = vmul.f32 %v1286_v49, %v2304_v18  ;;  %v1216_v8 = vmul.f32 0.5, %v1878_v34  ;;  %1887 = vtanh.f32 %v1019_v48  ;;  %v2435_v53 = vadd.f32 %v2365_v7, %v2256_v46  ;;  %v762_v13 = vpop.f32.mrf.mxu0 }
 0x1e0   : > { %v1403_v60 = vadd.f32 %v1402_v35, %v1337_v31  ;;  %1889 = vtanh.f32 %v1028_v33  ;;  %v1029_v6 = vmul.f32 0.5, %v2430_v4  ;;  %v2440_v2 = vadd.f32 %v2342_v20, %v2333_v5  ;;  %v2442_v11 = vpop.f32.mrf.mxu1 }
 0x1e1   : > { %v1392_v40 = vadd.f32 %v1391_v27, %v1356_v0  ;;  %v1207_v12 = vmul.f32 0.5, %v1876_v32  ;;  %v1296_v47 = vadd.f32 0.5, %v1216_v8  ;;  %v1038_v18 = vmul.f32 0.5, %v2435_v53 }
 0x1e2   : > { %v990_v43 = vmul.f32 0.5, %v2426_v3  ;;  %1891 = vtanh.f32 %v1029_v6  ;;  %v2448_v7 = vadd.f32 %v2353_v56, %v2322_v51  ;;  %v2451_v31 = vadd.f32 %v754_v52, %v2274_v59  ;;  %v1880_v20 = vpop.eup %1879  ;;  %v2463_v52 = vpop.f32.mrf.mxu1 }
 0x1e3   : > { %v1277_v28 = vadd.f32 0.5, %v1197_v39  ;;  %v1393_v63 = vadd.f32 %v1392_v40, %v1366_v58  ;;  %v1376_v37 = vmul.f32 %v1296_v47, %v2340_v19  ;;  %v2455_v35 = vadd.f32 %v758_v9, %v2256_v46  ;;  %v764_v58 = vpop.f32.mrf.mxu0 }
 0x1e4   : > { %v991_v49 = vmul.f32 0.5, %v2440_v2  ;;  %1893 = vtanh.f32 %v1038_v18  ;;  %v1039_v32 = vmul.f32 0.5, %v2451_v31  ;;  %v2461_v56 = vadd.f32 %v2359_v36, %v2333_v5  ;;  %v2476_v18 = vpop.f32.mrf.mxu1 }
 0x1e5   : > { %v1882_v27 = vpop.eup %1881  ;;  %v1239_v0 = vadd.f32 0.5, %v1159_v54  ;;  %v1394_v39 = vadd.f32 %v1393_v63, %v1376_v37  ;;  %v1048_v48 = vmul.f32 0.5, %v2455_v35  ;;  %v2467_v19 = vadd.f32 %v760_v42, %v2274_v59  ;;  %2914 = vst [vmem:[#allocation4_spill] sm:$0xff] %v2476_v18  ;;  %v2488_v37 = vpop.f32.mrf.mxu0 }
 0x1e6   : > { %v1168_v9 = vmul.f32 0.5, %v1880_v20  ;;  %v1287_v33 = vadd.f32 0.5, %v1207_v12  ;;  %1895 = vtanh.f32 %v990_v43  ;;  %v1000_v34 = vmul.f32 0.5, %v2448_v7 }
 0x1e7   : > { %v1884_v8 = vpop.eup %1883  ;;  %v1404_v6 = vadd.f32 %v1403_v60, %v1347_v45  ;;  %1897 = vtanh.f32 %v1039_v32  ;;  %v1049_v36 = vmul.f32 0.5, %v2467_v19  ;;  %v2472_v40 = vadd.f32 %v762_v13, %v2256_v46 }
 0x1e8   : > { %v1357_v54 = vmul.f32 %v1277_v28, %v2301_v15  ;;  %v1169_v47 = vmul.f32 0.5, %v1882_v27  ;;  %1899 = vtanh.f32 %v991_v49  ;;  %v1001_v42 = vmul.f32 0.5, %v2461_v56 }
 0x1e9   : > { %v1886_v12 = vpop.eup %1885  ;;  %v1395_v43 = vrot.slane %v1394_v39, 4  ;;  %1901 = vtanh.f32 %v1048_v48  ;;  %v1058_v20 = vmul.f32 0.5, %v2472_v40  ;;  %v2480_v45 = vadd.f32 %v764_v58, %v2274_v59 }
 0x1ea   : > { %v1367_v60 = vmul.f32 %v1287_v33, %v2315_v44  ;;  %v1178_v46 = vmul.f32 0.5, %v1884_v8  ;;  %v1217_v13 = vmul.f32 0.5, %v1886_v12  ;;  %1903 = vtanh.f32 %v1000_v34  ;;  %v2492_v44 = vpop.f32.mrf.mxu1 }
 0x1eb   : > { %v1248_v15 = vadd.f32 0.5, %v1168_v9  ;;  %v2485_v28 = vadd.f32 %v2372_v41, %v2322_v51  ;;  %1905 = vtanh.f32 %v1049_v36  ;;  %v1059_v63 = vmul.f32 0.5, %v2480_v45 }
 0x1ec   : > { %v1888_v49 = vpop.eup %1887  ;;  %v1318_v59 = vmul.f32 %v2422_v1, %v2298_v14  ;;  %v1405_v32 = vadd.f32 %v1404_v6, %v1357_v54  ;;  %v1297_v27 = vadd.f32 0.5, %v1217_v13  ;;  %1907 = vtanh.f32 %v1001_v42  ;;  %v2502_v6 = vpop.f32.mrf.mxu0 }
 0x1ed   : > { %v1890_v48 = vpop.eup %1889  ;;  %v1319_v9 = vmul.f32 %v1239_v0, %v2309_v24  ;;  %v1249_v33 = vadd.f32 0.5, %v1169_v47  ;;  %v1396_v41 = vadd.f32 %v1395_v43, %v1394_v39  ;;  %1909 = vtanh.f32 %v1058_v20 }
 0x1ee   : > { %v1406_v34 = vadd.f32 %v1405_v32, %v1367_v60  ;;  %v1258_v58 = vadd.f32 0.5, %v1178_v46  ;;  %v1377_v8 = vmul.f32 %v1297_v27, %v2386_v38  ;;  %v1179_v36 = vmul.f32 0.5, %v1888_v49  ;;  %v2508_v38 = vpop.f32.mrf.mxu1  ;;  %v2524_v49 = vpop.f32.mrf.mxu0 }
 0x1ef   : > { %v1892_v12 = vpop.eup %1891  ;;  %v1328_v18 = vmul.f32 %v1248_v15, %v2337_v16  ;;  %v1010_v14 = vmul.f32 0.5, %v2485_v28  ;;  %v2500_v1 = vadd.f32 %v2381_v30, %v2333_v5  ;;  %1911 = vtanh.f32 %v1059_v63 }
 0x1f0   : > { %v1407_v24 = vadd.f32 %v1406_v34, %v1377_v8  ;;  %v1188_v0 = vmul.f32 0.5, %v1890_v48  ;;  %v1189_v39 = vmul.f32 0.5, %v1892_v12  ;;  %v2506_v54 = vadd.f32 %v2389_v57, %v2322_v51 }
 0x1f1   : > { %v1894_v47 = vpop.eup %1893  ;;  %v1414_v16 = vadd.f32 %v1318_v59, %v2402_v17  ;;  %v1329_v42 = vmul.f32 %v1249_v33, %v2356_v55  ;;  %v1397_v43 = vrot.slane %v1396_v41, 2  ;;  %v2915_v30 = vsub.s32 1, %v2218_v26 }
 0x1f2   : > { %v1427_v60 = vadd.f32 %v1319_v9, %v2415_v62  ;;  %v1338_v46 = vmul.f32 %v1258_v58, %v2363_v25  ;;  %v1259_v13 = vadd.f32 0.5, %v1179_v36  ;;  %v2521_v57 = vadd.f32 %v2399_v10, %v2333_v5  ;;  %v2527_v25 = vpop.f32.mrf.mxu1 }
 0x1f3   : > { %v2515_v20 = vrot.slane %v2379_v29, %v2915_v30  ;;  %v1896_v15 = vpop.eup %1895  ;;  %v1415_v63 = vadd.f32 %v1414_v16, %v1328_v18  ;;  %v1198_v17 = vmul.f32 0.5, %v1894_v47  ;;  %1913 = vtanh.f32 %v1010_v14  ;;  %v2535_v16 = vpop.f32.mrf.mxu0 }
 0x1f4   : > { %v1011_v55 = vmul.f32 0.5, %v2500_v1  ;;  %v1898_v59 = vpop.eup %1897  ;;  %v1408_v29 = vrot.slane %v1407_v24, 4  ;;  %v1268_v32 = vadd.f32 0.5, %v1188_v0  ;;  %v1269_v27 = vadd.f32 0.5, %v1189_v39  ;;  %v2539_v30 = vpop.f32.mrf.mxu1 }
 0x1f5   : > { %v1020_v62 = vmul.f32 0.5, %v2506_v54  ;;  %v1900_v48 = vpop.eup %1899  ;;  %v1428_v9 = vadd.f32 %v1427_v60, %v1329_v42  ;;  %v1398_v10 = vadd.f32 %v1397_v43, %v1396_v41  ;;  %v1199_v33 = vmul.f32 0.5, %v1898_v59 }
 0x1f6   : > { %v2531_v18 = vadd.f32 %v2417_v23, %v2322_v51  ;;  %v1902_v34 = vpop.eup %1901  ;;  %v1416_v58 = vadd.f32 %v1415_v63, %v1338_v46  ;;  %v1339_v8 = vmul.f32 %v1259_v13, %v2407_v50  ;;  %v1150_v36 = vmul.f32 0.5, %v1896_v15 }
 0x1f7   : > { %v1021_v12 = vmul.f32 0.5, %v2521_v57  ;;  %v1904_v14 = vpop.eup %1903  ;;  %v1278_v0 = vadd.f32 0.5, %v1198_v17  ;;  %v1279_v39 = vadd.f32 0.5, %v1199_v33  ;;  %v1208_v47 = vmul.f32 0.5, %v1902_v34 }
 0x1f8   : > { %1915 = vtanh.f32 %v1011_v55  ;;  %v1906_v41 = vpop.eup %1905  ;;  %v1409_v42 = vadd.f32 %v1408_v29, %v1407_v24  ;;  %v1348_v43 = vmul.f32 %v1268_v32, %v2411_v61  ;;  %v1349_v23 = vmul.f32 %v1269_v27, %v2430_v4  ;;  %v2544_v32 = vpop.f32.mrf.mxu0 }
 0x1f9   : > { %1917 = vtanh.f32 %v1020_v62  ;;  %v1908_v50 = vpop.eup %1907  ;;  %v1399_v60 = vrot.slane %v1398_v10, 1  ;;  %v1288_v46 = vadd.f32 0.5, %v1208_v47  ;;  %v1209_v13 = vmul.f32 0.5, %v1906_v41 }
 0x1fa   : > { %v1030_v15 = vmul.f32 0.5, %v2531_v18  ;;  %v1910_v63 = vpop.eup %1909  ;;  %v1429_v17 = vadd.f32 %v1428_v9, %v1339_v8  ;;  %v1230_v55 = vadd.f32 0.5, %v1150_v36  ;;  %v1151_v59 = vmul.f32 0.5, %v1900_v48  ;;  %v2550_v9 = vpop.f32.mrf.mxu1 }
 0x1fb   : > { %1919 = vtanh.f32 %v1021_v12  ;;  %v1358_v24 = vmul.f32 %v1278_v0, %v2435_v53  ;;  %v1160_v29 = vmul.f32 0.5, %v1904_v14  ;;  %v1359_v61 = vmul.f32 %v1279_v39, %v2451_v31 }
 0x1fc   : > { %v1289_v4 = vadd.f32 0.5, %v1209_v13  ;;  %v1912_v27 = vpop.eup %1911  ;;  %v1410_v62 = vrot.slane %v1409_v42, 2  ;;  %v1417_v33 = vadd.f32 %v1416_v58, %v1348_v43  ;;  %v1430_v34 = vadd.f32 %v1429_v17, %v1349_v23 }
 0x1fd   : > { %v2548_v47 = vadd.f32 %v2488_v37, %v2345_v22  ;;  %v1161_v48 = vmul.f32 0.5, %v1908_v50  ;;  %v1368_v8 = vmul.f32 %v1288_v46, %v2455_v35  ;;  %v1218_v36 = vmul.f32 0.5, %v1910_v63  ;;  %v886_v37 = vpop.f32.mrf.mxu0 }
 0x1fe   : > { %v1369_v53 = vmul.f32 %v1289_v4, %v2467_v19  ;;  %v2554_v31 = vadd.f32 %v1399_v60, %v1398_v10  ;;  %v1310_v12 = vmul.f32 %v1230_v55, %v2426_v3  ;;  %v1231_v14 = vadd.f32 0.5, %v1151_v59  ;;  %v2560_v19 = vpop.f32.mrf.mxu1 }
 0x1ff   : > { %v1219_v0 = vmul.f32 0.5, %v1912_v27  ;;  %v1418_v58 = vadd.f32 %v1417_v33, %v1358_v24  ;;  %v1240_v39 = vadd.f32 0.5, %v1160_v29  ;;  %v1431_v41 = vadd.f32 %v1430_v34, %v1359_v61  ;;  %v2917_v34 = vld [vmem:[#allocation4_spill] sm:$0xff] }
 0x200   : > { %2916 = vst [vmem:[#allocation5_spill] sm:$0xff] %v2554_v31  ;;  %v1298_v43 = vadd.f32 0.5, %v1218_v36  ;;  %v1914_v23 = vpop.eup %1913  ;;  %v2557_v13 = vadd.f32 %v1410_v62, %v1409_v42  ;;  %1921 = vtanh.f32 %v1030_v15  ;;  %v992_v35 = vmul.f32 0.5, %v2548_v47  ;;  %v2583_v27 = vpop.f32.mrf.mxu1 }
 0x201   : > { %v1299_v50 = vadd.f32 0.5, %v1219_v0  ;;  %v1241_v10 = vadd.f32 0.5, %v1161_v48  ;;  %v1419_v60 = vadd.f32 %v1418_v58, %v1368_v8  ;;  %v1432_v46 = vadd.f32 %v1431_v41, %v1369_v53 }
 0x202   : > { %v1378_v3 = vmul.f32 %v1298_v43, %v2472_v40  ;;  %v2566_v17 = vadd.f32 %v2442_v11, %v2333_v5  ;;  %v2570_v42 = vadd.f32 %v2502_v6, %v2368_v21  ;;  %v2574_v15 = vadd.f32 %v2463_v52, %v2322_v51  ;;  %v2606_v43 = vpop.f32.mrf.mxu1 }
 0x203   : > { %v1379_v63 = vmul.f32 %v1299_v50, %v2480_v45  ;;  %v2577_v55 = vmul.f32 %v1231_v14, %v2440_v2  ;;  %v1320_v59 = vmul.f32 %v1240_v39, %v2448_v7  ;;  %v1170_v40 = vmul.f32 0.5, %v1914_v23  ;;  %v888_v45 = vpop.f32.mrf.mxu0 }
 0x204   : > { %v1420_v24 = vadd.f32 %v1419_v60, %v1378_v3  ;;  %v1412_v11 = vrot.slane %v2557_v13, 1  ;;  %v1031_v4 = vmul.f32 0.5, %v2566_v17  ;;  %v1040_v6 = vmul.f32 0.5, %v2574_v15 }
 0x205   : > { %v1916_v29 = vpop.eup %1915  ;;  %v1433_v61 = vadd.f32 %v1432_v46, %v1379_v63  ;;  %v2586_v62 = vmul.f32 %v1241_v10, %v2461_v56  ;;  %1923 = vtanh.f32 %v992_v35  ;;  %v993_v2 = vmul.f32 0.5, %v2570_v42  ;;  %v890_v58 = vpop.f32.mrf.mxu0 }
 0x206   : > { %v1918_v52 = vpop.eup %1917  ;;  %v2591_v7 = vadd.f32 %v2524_v49, %v2345_v22  ;;  %1925 = vtanh.f32 %v1031_v4  ;;  %v2595_v48 = vadd.f32 %v2917_v34, %v2333_v5  ;;  %v2599_v8 = vadd.f32 %v2535_v16, %v2368_v21 }
 0x207   : > { %v1434_v33 = vrot.slane %v1433_v61, 4  ;;  %v1250_v56 = vadd.f32 0.5, %v1170_v40  ;;  %v1171_v36 = vmul.f32 0.5, %v1916_v29  ;;  %v1421_v14 = vrot.slane %v1420_v24, 4  ;;  %v894_v3 = vpop.f32.mrf.mxu0 }
 0x208   : > { %v1920_v53 = vpop.eup %1919  ;;  %v1002_v0 = vmul.f32 0.5, %v2591_v7  ;;  %v2602_v39 = vadd.f32 %v1320_v59, %v1310_v12  ;;  %1927 = vtanh.f32 %v1040_v6  ;;  %v1041_v49 = vmul.f32 0.5, %v2595_v48 }
 0x209   : > { %v1003_v41 = vmul.f32 0.5, %v2599_v8  ;;  %v1435_v23 = vadd.f32 %v1434_v33, %v1433_v61  ;;  %v2610_v16 = vadd.f32 %v2492_v44, %v2322_v51  ;;  %v2614_v50 = vadd.f32 %v2544_v32, %v2345_v22 }
 0x20a   : > { %1929 = vtanh.f32 %v1002_v0  ;;  %v1180_v35 = vmul.f32 0.5, %v1918_v52  ;;  %v2618_v12 = vadd.f32 %v2508_v38, %v2333_v5  ;;  %v2621_v10 = vadd.f32 %v886_v37, %v2368_v21  ;;  %v2631_v38 = vpop.f32.mrf.mxu1 }
 0x20b   : > { %1931 = vtanh.f32 %v993_v2  ;;  %v1422_v60 = vadd.f32 %v1421_v14, %v1420_v24  ;;  %v1050_v46 = vmul.f32 0.5, %v2610_v16  ;;  %v1012_v44 = vmul.f32 0.5, %v2614_v50  ;;  %v896_v2 = vpop.f32.mrf.mxu0  ;;  %v2918_v14 = vld [vmem:[#allocation3_spill] sm:$0xff] }
 0x20c   : > { %1933 = vtanh.f32 %v1041_v49  ;;  %v1051_v32 = vmul.f32 0.5, %v2618_v12  ;;  %v1013_v63 = vmul.f32 0.5, %v2621_v10  ;;  %v2629_v59 = vadd.f32 %v2527_v25, %v2322_v51 }
 0x20d   : > { %1935 = vtanh.f32 %v1003_v41  ;;  %v1922_v37 = vpop.eup %1921  ;;  %v1436_v40 = vrot.slane %v1435_v23, 2  ;;  %v2634_v24 = vadd.f32 %v888_v45, %v2345_v22  ;;  %v2638_v29 = vadd.f32 %v2539_v30, %v2333_v5  ;;  %v2646_v5 = vpop.f32.mrf.mxu1 }
 0x20e   : > { %1937 = vtanh.f32 %v1050_v46  ;;  %v1251_v61 = vadd.f32 0.5, %v1171_v36  ;;  %v1260_v4 = vadd.f32 0.5, %v1180_v35  ;;  %v1060_v6 = vmul.f32 0.5, %v2629_v59 }
 0x20f   : > { %1939 = vtanh.f32 %v1012_v44  ;;  %v1423_v52 = vrot.slane %v1422_v60, 2  ;;  %v1022_v51 = vmul.f32 0.5, %v2634_v24  ;;  %v1061_v25 = vmul.f32 0.5, %v2638_v29 }
 0x210   : > { %1941 = vtanh.f32 %v1051_v32  ;;  %v1181_v33 = vmul.f32 0.5, %v1920_v53  ;;  %v1190_v34 = vmul.f32 0.5, %v1922_v37  ;;  %v2644_v45 = vadd.f32 %v890_v58, %v2368_v21 }
 0x211   : > { %1943 = vtanh.f32 %v1013_v63  ;;  %v1437_v30 = vadd.f32 %v1436_v40, %v1435_v23  ;;  %v2649_v36 = vadd.f32 %v894_v3, %v2345_v22  ;;  %v2653_v0 = vadd.f32 %v2550_v9, %v2918_v14  ;;  %v2663_v63 = vpop.f32.mrf.mxu1 }
 0x212   : > { %1945 = vtanh.f32 %v1060_v6  ;;  %v1924_v49 = vpop.eup %1923  ;;  %v1330_v41 = vmul.f32 %v1250_v56, %v2485_v28  ;;  %v1023_v53 = vmul.f32 0.5, %v2644_v45  ;;  %v2658_v58 = vadd.f32 %v896_v2, %v2368_v21 }
 0x213   : > { %1947 = vtanh.f32 %v1022_v51  ;;  %v1926_v35 = vpop.eup %1925  ;;  %v1331_v23 = vmul.f32 %v1251_v61, %v2500_v1  ;;  %v1424_v46 = vadd.f32 %v1423_v52, %v1422_v60  ;;  %v1032_v44 = vmul.f32 0.5, %v2649_v36 }
 0x214   : > { %1949 = vtanh.f32 %v1061_v25  ;;  %v1261_v3 = vadd.f32 0.5, %v1181_v33  ;;  %v1270_v32 = vadd.f32 0.5, %v1190_v34  ;;  %v994_v9 = vmul.f32 0.5, %v2653_v0  ;;  %v898_v33 = vpop.f32.mrf.mxu0 }
 0x215   : > { %1951 = vtanh.f32 %v1023_v53  ;;  %v1928_v28 = vpop.eup %1927  ;;  %v1340_v56 = vmul.f32 %v1260_v4, %v2506_v54  ;;  %v1438_v37 = vrot.slane %v1437_v30, 1  ;;  %v1152_v40 = vmul.f32 0.5, %v1924_v49 }
 0x216   : > { %1953 = vtanh.f32 %v1032_v44  ;;  %v2669_v1 = vadd.f32 %v1412_v11, %v2557_v13  ;;  %v1453_v60 = vadd.f32 %v2586_v62, %v2577_v55  ;;  %v1191_v61 = vmul.f32 0.5, %v1926_v35  ;;  %v2681_v55 = vpop.f32.mrf.mxu1 }
 0x217   : > { %v1930_v6 = vpop.eup %1929  ;;  %v1033_v52 = vmul.f32 0.5, %v2658_v58  ;;  %v1441_v25 = vadd.f32 %v2602_v39, %v1330_v41  ;;  %v1425_v2 = vrot.slane %v1424_v46, 1  ;;  %v1200_v54 = vmul.f32 0.5, %v1928_v28 }
 0x218   : > { %v1932_v51 = vpop.eup %1931  ;;  %v2677_v4 = vadd.f32 %v2560_v19, %v2515_v20  ;;  %v1341_v13 = vmul.f32 %v1261_v3, %v2521_v57  ;;  %v1350_v11 = vmul.f32 %v1270_v32, %v2531_v18  ;;  %v1162_v49 = vmul.f32 0.5, %v1930_v6 }
 0x219   : > { %v1934_v34 = vpop.eup %1933  ;;  %1955 = vtanh.f32 %v994_v9  ;;  %v1454_v53 = vadd.f32 %v1453_v60, %v1331_v23  ;;  %v1442_v35 = vadd.f32 %v1441_v25, %v1340_v56  ;;  %v2683_v39 = vadd.f32 %v1438_v37, %v1437_v30 }
 0x21a   : > { %v1936_v62 = vpop.eup %1935  ;;  %v1232_v41 = vadd.f32 0.5, %v1152_v40  ;;  %v1271_v28 = vadd.f32 0.5, %v1191_v61  ;;  %v1153_v19 = vmul.f32 0.5, %v1932_v51  ;;  %1957 = vtanh.f32 %v1033_v52  ;;  %v2691_v40 = vpop.f32.mrf.mxu1 }
 0x21b   : > { %2919 = vst [vmem:[#allocation4_spill] sm:$0xff] %v2683_v39  ;;  %v1938_v44 = vpop.eup %1937  ;;  %v2686_v31 = vadd.f32 %v898_v33, %v2345_v22  ;;  %v2688_v3 = vadd.f32 %v1425_v2, %v1424_v46  ;;  %v1280_v18 = vadd.f32 0.5, %v1200_v54  ;;  %v995_v9 = vmul.f32 0.5, %v2677_v4 }
 0x21c   : > { %v1940_v57 = vpop.eup %1939  ;;  %v1210_v32 = vmul.f32 0.5, %v1938_v44  ;;  %v1455_v23 = vadd.f32 %v1454_v53, %v1341_v13  ;;  %v1443_v56 = vadd.f32 %v1442_v35, %v1350_v11  ;;  %v1242_v30 = vadd.f32 0.5, %v1162_v49  ;;  %v900_v35 = vpop.f32.mrf.mxu0 }
 0x21d   : > { %2920 = vst [vmem:[#allocation3_spill] sm:$0xff] %v2688_v3  ;;  %v1942_v6 = vpop.eup %1941  ;;  %v1201_v37 = vmul.f32 0.5, %v1934_v34  ;;  %v1312_v52 = vmul.f32 %v1232_v41, %v2548_v47  ;;  %v1163_v51 = vmul.f32 0.5, %v1936_v62  ;;  %v1351_v2 = vmul.f32 %v1271_v28, %v2566_v17  ;;  %v2704_v28 = vpop.f32.mrf.mxu1 }
 0x21e   : > { %v1944_v60 = vpop.eup %1943  ;;  %v1290_v46 = vadd.f32 0.5, %v1210_v32  ;;  %v1233_v54 = vadd.f32 0.5, %v1153_v19  ;;  %v1042_v33 = vmul.f32 0.5, %v2686_v31  ;;  %v2700_v13 = vadd.f32 %v2583_v27, %v2918_v14 }
 0x21f   : > { %v1946_v25 = vpop.eup %1945  ;;  %v1360_v11 = vmul.f32 %v1280_v18, %v2574_v15  ;;  %v1211_v49 = vmul.f32 0.5, %v1942_v6  ;;  %1959 = vtanh.f32 %v995_v9  ;;  %v1322_v62 = vmul.f32 %v1242_v30, %v2591_v7 }
 0x220   : > { %v1948_v34 = vpop.eup %1947  ;;  %v1220_v53 = vmul.f32 0.5, %v1946_v25  ;;  %v1281_v41 = vadd.f32 0.5, %v1201_v37  ;;  %v1172_v44 = vmul.f32 0.5, %v1940_v57  ;;  %v1173_v17 = vmul.f32 0.5, %v1944_v60  ;;  %v2714_v25 = vpop.f32.mrf.mxu1 }
 0x221   : > { %v1950_v47 = vpop.eup %1949  ;;  %v1243_v32 = vadd.f32 0.5, %v1163_v51  ;;  %v1370_v27 = vmul.f32 %v1290_v46, %v2610_v16  ;;  %v1182_v15 = vmul.f32 0.5, %v1948_v34  ;;  %1961 = vtanh.f32 %v1042_v33  ;;  %v904_v46 = vpop.f32.mrf.mxu0 }
 0x222   : > { %v1952_v19 = vpop.eup %1951  ;;  %v1300_v61 = vadd.f32 0.5, %v1220_v53  ;;  %v1221_v39 = vmul.f32 0.5, %v1950_v47  ;;  %v1004_v18 = vmul.f32 0.5, %v2700_v13  ;;  %v2709_v9 = vadd.f32 %v900_v35, %v2368_v21 }
 0x223   : > { %v1954_v3 = vpop.eup %1953  ;;  %v1444_v7 = vadd.f32 %v1443_v56, %v1360_v11  ;;  %v1291_v6 = vadd.f32 0.5, %v1211_v49  ;;  %v1183_v30 = vmul.f32 0.5, %v1952_v19  ;;  %v1313_v37 = vmul.f32 %v1233_v54, %v2570_v42 }
 0x224   : > { %v1380_v57 = vmul.f32 %v1300_v61, %v2629_v59  ;;  %v1361_v60 = vmul.f32 %v1281_v41, %v2595_v48  ;;  %v1252_v16 = vadd.f32 0.5, %v1172_v44  ;;  %v1253_v51 = vadd.f32 0.5, %v1173_v17 }
 0x225   : > { %v1323_v34 = vmul.f32 %v1243_v32, %v2599_v8  ;;  %v1445_v53 = vadd.f32 %v1444_v7, %v1370_v27  ;;  %v1301_v35 = vadd.f32 0.5, %v1221_v39  ;;  %v1192_v47 = vmul.f32 0.5, %v1954_v3  ;;  %v906_v8 = vpop.f32.mrf.mxu0  ;;  %v2721_v39 = vpop.f32.mrf.mxu1 }
 0x226   : > { %v1956_v33 = vpop.eup %1955  ;;  %v1456_v56 = vadd.f32 %v1455_v23, %v1351_v2  ;;  %v1262_v11 = vadd.f32 0.5, %v1182_v15  ;;  %1963 = vtanh.f32 %v1004_v18  ;;  %v1043_v59 = vmul.f32 0.5, %v2709_v9 }
 0x227   : > { %v1958_v61 = vpop.eup %1957  ;;  %v1466_v42 = vadd.f32 %v1322_v62, %v1312_v52  ;;  %v1371_v48 = vmul.f32 %v1291_v6, %v2618_v12  ;;  %v1446_v54 = vadd.f32 %v1445_v53, %v1380_v57  ;;  %v1263_v49 = vadd.f32 0.5, %v1183_v30  ;;  %v908_v57 = vpop.f32.mrf.mxu0 }
 0x228   : > { %v1332_v41 = vmul.f32 %v1252_v16, %v2614_v50  ;;  %v1333_v44 = vmul.f32 %v1253_v51, %v2621_v10  ;;  %v1154_v17 = vmul.f32 0.5, %v1956_v33  ;;  %1965 = vtanh.f32 %v1043_v59 }
 0x229   : > { %v1457_v3 = vadd.f32 %v1456_v56, %v1361_v60  ;;  %v1479_v23 = vadd.f32 %v1323_v34, %v1313_v37  ;;  %v1381_v2 = vmul.f32 %v1301_v35, %v2638_v29  ;;  %v1272_v19 = vadd.f32 0.5, %v1192_v47  ;;  %v910_v56 = vpop.f32.mrf.mxu0 }
 0x22a   : > { %v1342_v52 = vmul.f32 %v1262_v11, %v2634_v24  ;;  %v1193_v62 = vmul.f32 0.5, %v1958_v61  ;;  %v2727_v12 = vadd.f32 %v2606_v43, %v2515_v20  ;;  %v2730_v50 = vadd.f32 %v904_v46, %v2345_v22  ;;  %v977_v43 = vpop.f32.mrf.mxu1 }
 0x22b   : > { %v1458_v10 = vadd.f32 %v1457_v3, %v1371_v48  ;;  %v1447_v32 = vrot.slane %v1446_v54, 4  ;;  %v1343_v27 = vmul.f32 %v1263_v49, %v2644_v45  ;;  %v2735_v15 = vadd.f32 %v2631_v38, %v2918_v14 }
 0x22c   : > { %v1960_v29 = vpop.eup %1959  ;;  %v1467_v18 = vadd.f32 %v1466_v42, %v1332_v41  ;;  %v1480_v7 = vadd.f32 %v1479_v23, %v1333_v44  ;;  %v1234_v24 = vadd.f32 0.5, %v1154_v17  ;;  %v1005_v6 = vmul.f32 0.5, %v2727_v12  ;;  %v979_v11 = vpop.f32.mrf.mxu1 }
 0x22d   : > { %v1459_v30 = vadd.f32 %v1458_v10, %v1381_v2  ;;  %v1352_v37 = vmul.f32 %v1272_v19, %v2649_v36  ;;  %v1052_v60 = vmul.f32 0.5, %v2730_v50  ;;  %v1014_v16 = vmul.f32 0.5, %v2735_v15 }
 0x22e   : > { %v1468_v45 = vadd.f32 %v1467_v18, %v1342_v52  ;;  %v1273_v51 = vadd.f32 0.5, %v1193_v62  ;;  %1967 = vtanh.f32 %v1005_v6  ;;  %v2742_v38 = vadd.f32 %v906_v8, %v2368_v21  ;;  %v1962_v46 = vpop.eup %1961  ;;  %v981_v3 = vpop.f32.mrf.mxu1 }
 0x22f   : > { %v2744_v33 = vadd.f32 %v1447_v32, %v1446_v54  ;;  %v2746_v34 = vadd.f32 %v1480_v7, %v1343_v27  ;;  %1969 = vtanh.f32 %v1052_v60  ;;  %v2750_v53 = vadd.f32 %v2646_v5, %v2515_v20 }
 0x230   : > { %v2753_v36 = vmul.f32 %v1234_v24, %v2653_v0  ;;  %v2755_v35 = vmul.f32 0.5, %v1960_v29  ;;  %1971 = vtanh.f32 %v1014_v16  ;;  %v1053_v47 = vmul.f32 0.5, %v2742_v38  ;;  %v983_v27 = vpop.f32.mrf.mxu1 }
 0x231   : > { %v1460_v59 = vrot.slane %v1459_v30, 4  ;;  %v2758_v61 = vadd.f32 %v1468_v45, %v1352_v37  ;;  %v1015_v42 = vmul.f32 0.5, %v2750_v53  ;;  %v2762_v48 = vadd.f32 %v908_v57, %v2345_v22 }
 0x232   : > { %v2765_v5 = vmul.f32 %v1273_v51, %v2658_v58  ;;  %v1202_v0 = vmul.f32 0.5, %v1962_v46  ;;  %1973 = vtanh.f32 %v1053_v47  ;;  %v2769_v54 = vadd.f32 %v2663_v63, %v2918_v14 }
 0x233   : > { %v1964_v49 = vpop.eup %1963  ;;  %v1449_v41 = vrot.slane %v2744_v33, 2  ;;  %1975 = vtanh.f32 %v1015_v42  ;;  %v1062_v44 = vmul.f32 0.5, %v2762_v48  ;;  %v2775_v17 = vadd.f32 %v910_v56, %v2368_v21 }
 0x234   : > { %v1024_v22 = vmul.f32 0.5, %v2769_v54  ;;  %v2780_v58 = vadd.f32 %v2681_v55, %v2515_v20  ;;  %v2784_v63 = vadd.f32 %v2691_v40, %v2918_v14  ;;  %v2788_v8 = vadd.f32 %v2704_v28, %v2515_v20 }
 0x235   : > { %v1966_v23 = vpop.eup %1965  ;;  %v1461_v2 = vadd.f32 %v1460_v59, %v1459_v30  ;;  %1977 = vtanh.f32 %v1062_v44  ;;  %v1063_v21 = vmul.f32 0.5, %v2775_v17  ;;  %v2793_v19 = vadd.f32 %v2714_v25, %v2918_v14 }
 0x236   : > { %v1164_v55 = vmul.f32 0.5, %v1964_v49  ;;  %1979 = vtanh.f32 %v1024_v22  ;;  %v1025_v52 = vmul.f32 0.5, %v2780_v58  ;;  %v1034_v40 = vmul.f32 0.5, %v2784_v63 }
 0x237   : > { %1981 = vtanh.f32 %v1063_v21  ;;  %v1035_v28 = vmul.f32 0.5, %v2788_v8  ;;  %v1044_v62 = vmul.f32 0.5, %v2793_v19  ;;  %v1203_v10 = vmul.f32 0.5, %v1966_v23 }
 0x238   : > { %1983 = vtanh.f32 %v1025_v52  ;;  %v2806_v25 = vadd.f32 %v2721_v39, %v2515_v20  ;;  %v2809_v32 = vadd.f32 %v977_v43, %v2918_v14  ;;  %v2812_v29 = vadd.f32 %v979_v11, %v2515_v20 }
 0x239   : > { %1985 = vtanh.f32 %v1034_v40  ;;  %v2815_v18 = vadd.f32 %v981_v3, %v2918_v14  ;;  %v2921_v7 = vlaneseq  ;;  %v1282_v6 = vadd.f32 0.5, %v1202_v0 }
 0x23a   : > { %1987 = vtanh.f32 %v1035_v28  ;;  %v1045_v39 = vmul.f32 0.5, %v2806_v25  ;;  %v1054_v57 = vmul.f32 0.5, %v2809_v32  ;;  %v2027_v43 = vmov 0.0  }
 0x23b   : > { %vm2818_vm1 = vcmp.lt.s32.totalorder %v2921_v7, 256  ;;  %v1968_v30 = vpop.eup %1967  ;;  %1989 = vtanh.f32 %v1044_v62  ;;  %v1055_v14 = vmul.f32 0.5, %v2812_v29  ;;  %v1064_v37 = vmul.f32 0.5, %v2815_v18 }
 0x23c   : > { %261 = vst.msk [vmem:[%s2800_s11 + $0x8] sm:$0x3] %vm2818_vm1, %v2027_v43  ;;  %v2830_v60 = vadd.f32 %v983_v27, %v2515_v20  ;;  %v1970_v16 = vpop.eup %1969  ;;  %v1462_v45 = vrot.slane %v1461_v2, 2  ;;  %v1244_v51 = vadd.f32 0.5, %v1164_v55  ;;  %v1165_v46 = vmul.f32 0.5, %v1968_v30 }
 0x23d   : > { %1991 = vtanh.f32 %v1045_v39  ;;  %v1972_v47 = vpop.eup %1971  ;;  %v1283_v56 = vadd.f32 0.5, %v1203_v10  ;;  %v1212_v11 = vmul.f32 0.5, %v1970_v16  ;;  %v1235_v42 = vadd.f32 0.5, %v2755_v35 }
 0x23e   : > { %1993 = vtanh.f32 %v1054_v57  ;;  %v1065_v59 = vmul.f32 0.5, %v2830_v60  ;;  %v1245_v0 = vadd.f32 0.5, %v1165_v46  ;;  %v1174_v49 = vmul.f32 0.5, %v1972_v47 }
 0x23f   : > { %1995 = vtanh.f32 %v1055_v14  ;;  %v1974_v44 = vpop.eup %1973  ;;  %v2835_v20 = vadd.f32 %v1449_v41, %v2744_v33  ;;  %v1362_v22 = vmul.f32 %v1282_v6, %v2686_v31  ;;  %v1292_v3 = vadd.f32 0.5, %v1212_v11 }
 0x240   : > { %1997 = vtanh.f32 %v1064_v37  ;;  %v1976_v23 = vpop.eup %1975  ;;  %v2838_v21 = vadd.f32 %v1462_v45, %v1461_v2  ;;  %v1324_v55 = vmul.f32 %v1244_v51, %v2700_v13  ;;  %v1213_v52 = vmul.f32 0.5, %v1974_v44 }
 0x241   : > { %1999 = vtanh.f32 %v1065_v59  ;;  %v1482_v35 = vadd.f32 %v2746_v34, %v2765_v5  ;;  %v1363_v40 = vmul.f32 %v1283_v56, %v2709_v9  ;;  %v1325_v28 = vmul.f32 %v1245_v0, %v2727_v12 }
 0x242   : > { %v1175_v33 = vmul.f32 0.5, %v1976_v23  ;;  %v1978_v41 = vpop.eup %1977  ;;  %v1315_v31 = vmul.f32 %v1235_v42, %v2677_v4  ;;  %v1372_v62 = vmul.f32 %v1292_v3, %v2730_v50  ;;  %v1254_v10 = vadd.f32 0.5, %v1174_v49 }
 0x243   : > { %v1293_v2 = vadd.f32 0.5, %v1213_v52  ;;  %v1980_v27 = vpop.eup %1979  ;;  %v1451_v13 = vrot.slane %v2835_v20, 1  ;;  %v1470_v7 = vadd.f32 %v2758_v61, %v1362_v22  ;;  %v1222_v39 = vmul.f32 0.5, %v1978_v41 }
 0x244   : > { %v1255_v6 = vadd.f32 0.5, %v1175_v33  ;;  %v1982_v34 = vpop.eup %1981  ;;  %v1464_v9 = vrot.slane %v2838_v21, 1  ;;  %v1492_v12 = vadd.f32 %v1324_v55, %v2753_v36  ;;  %v1184_v57 = vmul.f32 0.5, %v1980_v27 }
 0x245   : > { %v1373_v5 = vmul.f32 %v1293_v2, %v2742_v38  ;;  %v1984_v4 = vpop.eup %1983  ;;  %v1483_v43 = vadd.f32 %v1482_v35, %v1363_v40  ;;  %v1505_v50 = vadd.f32 %v1325_v28, %v1315_v31  ;;  %v1302_v30 = vadd.f32 0.5, %v1222_v39 }
 0x246   : > { %v1223_v14 = vmul.f32 0.5, %v1982_v34  ;;  %v1986_v37 = vpop.eup %1985  ;;  %v1471_v16 = vadd.f32 %v1470_v7, %v1372_v62  ;;  %v1334_v45 = vmul.f32 %v1254_v10, %v2735_v15  ;;  %v1264_v61 = vadd.f32 0.5, %v1184_v57 }
 0x247   : > { %v1185_v51 = vmul.f32 0.5, %v1984_v4  ;;  %v1988_v46 = vpop.eup %1987  ;;  %v1335_v47 = vmul.f32 %v1255_v6, %v2750_v53  ;;  %v1382_v56 = vmul.f32 %v1302_v30, %v2762_v48  ;;  %v1194_v11 = vmul.f32 0.5, %v1986_v37 }
 0x248   : > { %v1303_v36 = vadd.f32 0.5, %v1223_v14  ;;  %v1990_v38 = vpop.eup %1989  ;;  %v1484_v59 = vadd.f32 %v1483_v43, %v1373_v5  ;;  %v1344_v42 = vmul.f32 %v1264_v61, %v2769_v54  ;;  %v1195_v49 = vmul.f32 0.5, %v1988_v46 }
 0x249   : > { %v1265_v0 = vadd.f32 0.5, %v1185_v51  ;;  %v1472_v22 = vadd.f32 %v1471_v16, %v1382_v56  ;;  %v1274_v15 = vadd.f32 0.5, %v1194_v11  ;;  %v1204_v23 = vmul.f32 0.5, %v1990_v38 }
 0x24a   : > { %v1992_v44 = vpop.eup %1991  ;;  %v1383_v3 = vmul.f32 %v1303_v36, %v2775_v17  ;;  %v1493_v52 = vadd.f32 %v1492_v12, %v1334_v45  ;;  %v1275_v35 = vadd.f32 0.5, %v1195_v49  ;;  %v1506_v62 = vadd.f32 %v1505_v50, %v1335_v47 }
 0x24b   : > { %v1994_v55 = vpop.eup %1993  ;;  %v1345_v53 = vmul.f32 %v1265_v0, %v2780_v58  ;;  %v1205_v48 = vmul.f32 0.5, %v1992_v44  ;;  %v1473_v28 = vrot.slane %v1472_v22, 4  ;;  %v1354_v41 = vmul.f32 %v1274_v15, %v2784_v63  ;;  %v2926_v44 = vld [vmem:[#allocation5_spill] sm:$0xff]  ;;  %v2928_v15 = vld [vmem:[#allocation4_spill] sm:$0xff] }
 0x24c   : > { %v1996_v40 = vpop.eup %1995  ;;  %v1485_v33 = vadd.f32 %v1484_v59, %v1383_v3  ;;  %v1284_v54 = vadd.f32 0.5, %v1204_v23  ;;  %v1355_v10 = vmul.f32 %v1275_v35, %v2788_v8  ;;  %v1214_v17 = vmul.f32 0.5, %v1994_v55  ;;  %v2927_v3 = vld [vmem:[#allocation3_spill] sm:$0xff] }
 0x24d   : > { %v1998_v31 = vpop.eup %1997  ;;  %v1285_v2 = vadd.f32 0.5, %v1205_v48  ;;  %v1474_v7 = vadd.f32 %v1473_v28, %v1472_v22  ;;  %v1494_v6 = vadd.f32 %v1493_v52, %v1344_v42  ;;  %v1507_v34 = vadd.f32 %v1506_v62, %v1345_v53 }
 0x24e   : > { %v2000_v27 = vpop.eup %1999  ;;  %v1486_v39 = vrot.slane %v1485_v33, 4  ;;  %v1364_v58 = vmul.f32 %v1284_v54, %v2793_v19  ;;  %v1294_v5 = vadd.f32 0.5, %v1214_v17  ;;  %v1215_v57 = vmul.f32 0.5, %v1996_v40 }
 0x24f   : > { %v1365_v12 = vmul.f32 %v1285_v2, %v2806_v25  ;;  %v1475_v4 = vrot.slane %v1474_v7, 2  ;;  %v1495_v43 = vadd.f32 %v1494_v6, %v1354_v41  ;;  %v1224_v30 = vmul.f32 0.5, %v1998_v31 }
 0x250   : > { %v1487_v63 = vadd.f32 %v1486_v39, %v1485_v33  ;;  %v1508_v50 = vadd.f32 %v1507_v34, %v1355_v10  ;;  %v1374_v8 = vmul.f32 %v1294_v5, %v2809_v32  ;;  %v1295_v14 = vadd.f32 0.5, %v1215_v57  ;;  %v2924_v32 = vld [vmem:[#allocation2_spill] sm:$0xff]  ;;  %v1387_v57 = vld [vmem:[%s2800_s11 + $0x8] sm:$0x3] }
 0x251   : > { %v1225_v37 = vmul.f32 0.5, %v2000_v27  ;;  %v1476_v16 = vadd.f32 %v1475_v4, %v1474_v7  ;;  %v1496_v61 = vadd.f32 %v1495_v43, %v1364_v58  ;;  %v1304_v51 = vadd.f32 0.5, %v1224_v30 }
 0x252   : > { %v1488_v45 = vrot.slane %v1487_v63, 2  ;;  %v1465_v19 = vadd.f32 %v1464_v9, %v2838_v21  ;;  %v1509_v25 = vadd.f32 %v1508_v50, %v1365_v12  ;;  %v1375_v46 = vmul.f32 %v1295_v14, %v2812_v29 }
 0x253   : > { %v1305_v47 = vadd.f32 0.5, %v1225_v37  ;;  %v1477_v56 = vrot.slane %v1476_v16, 1  ;;  %v1497_v11 = vadd.f32 %v1496_v61, %v1374_v8  ;;  %v1384_v38 = vmul.f32 %v1304_v51, %v2815_v18 }
 0x254   : > { %v1489_v36 = vadd.f32 %v1488_v45, %v1487_v63  ;;  %v2925_v59 = vunpack.c.0.s8 %v2924_v32  ;;  %v1510_v0 = vadd.f32 %v1509_v25, %v1375_v46  ;;  %v1528_v22 = vcombine.low %v2926_v44, %v2669_v1 }
 0x255   : > { %v1385_v49 = vmul.f32 %v1305_v47, %v2830_v60  ;;  %v1452_v29 = vadd.f32 %v1451_v13, %v2835_v20  ;;  %v1498_v9 = vadd.f32 %v1497_v11, %v1384_v38  ;;  %v2929_v23 = vcombine.low %v2927_v3, %v2928_v15 }
 0x256   : > { %v1537_v42 = vsub.s32 %v2925_v59, %v2218_v26  ;;  %v1490_v21 = vrot.slane %v1489_v36, 1  ;;  %v1478_v53 = vadd.f32 %v1477_v56, %v1476_v16 }
 0x257   : > { %v1511_v55 = vadd.f32 %v1510_v0, %v1385_v49  ;;  %v1530_v52 = vcombine.low %v1452_v29, %v1465_v19  ;;  %v1499_v35 = vrot.slane %v1498_v9, 4 }
 0x258   : > { %v1545_v18 = vrot.slane %v2929_v23, %v1537_v42  ;;  %v1491_v26 = vadd.f32 %v1490_v21, %v1489_v36  ;;  %v1538_v60 = vrot.slane %v1528_v22, %v1537_v42 }
 0x259   : > { %v1512_v48 = vrot.slane %v1511_v55, 4  ;;  %v1500_v28 = vadd.f32 %v1499_v35, %v1498_v9  ;;  %v1552_v41 = vrot.slane %v1530_v52, %v1537_v42 }
 0x25a   : > { %v1531_v40 = vcombine.low %v1478_v53, %v1491_v26  ;;  %v1560_v33 = vcombine.low %v1538_v60, %v1545_v18 }
 0x25b   : > { %v1513_v1 = vadd.f32 %v1512_v48, %v1511_v55  ;;  %v1501_v20 = vrot.slane %v1500_v28, 2 }
 0x25c   : > { %v1559_v54 = vrot.slane %v1531_v40, %v1537_v42  ;;  %v1568_v2 = vrot.slane %v1560_v33, %v1537_v42 }
 0x25d   : > { %v1514_v13 = vrot.slane %v1513_v1, 2  ;;  %v1502_v62 = vadd.f32 %v1501_v20, %v1500_v28 }
 0x25e   : > { %v1561_v31 = vcombine.low %v1552_v41, %v1559_v54 }
 0x25f   : > { %v1515_v10 = vadd.f32 %v1514_v13, %v1513_v1  ;;  %v1503_v27 = vrot.slane %v1502_v62, 1 }
 0x260   : > { %v1575_v17 = vrot.slane %v1561_v31, %v1537_v42 }
 0x261   : > { %v1516_v7 = vrot.slane %v1515_v10, 1  ;;  %v1504_v39 = vadd.f32 %v1503_v27, %v1502_v62 }
 0x262   : > { %v1576_v6 = vcombine.low %v1568_v2, %v1575_v17 }
 0x263   : > { %v1517_v58 = vadd.f32 %v1516_v7, %v1515_v10 }
 0x264   : > { %v1607_v12 = vmul.f32 0.015625, %v1576_v6 }
 0x265   : > { %v1577_v34 = vcombine.low %v1504_v39, %v1517_v58 }
 0x266   : > { %1609 = vst [vmem:[%s2800_s11] sm:$0xff] %v1607_v12 }
 0x267   : > { %v1584_v5 = vrot.slane %v1577_v34, %v1537_v42 }
 0x269   : > { %v1591_v4 = vrot.slane %v1584_v5, %v1537_v42 }
 0x26b   : > { %v1595_v63 = vadd.f32 %v1591_v4, %v1387_v57 }
 0x26d   : > { %1601 = vst.msk [vmem:[%s2800_s11 + $0x8] sm:$0x3] %vm2818_vm1, %v1595_v63 }
 0x274   : > { %v1606_v43 = vld [vmem:[%s2800_s11 + $0x8] sm:$0x3] }
 0x275   : > { %v1608_v30 = vmul.f32 0.015625, %v1606_v43 }
 0x277   : > { %1610 = vst.msk [vmem:[%s2800_s11 + $0x8] sm:$0x3] %vm2818_vm1, %v1608_v30 }
 0x278 PF: > { %s15_s20 = sadd.s32 1, %s2023_s20   ;;  %s2930_s18 = smov %s2019_s19 }
 0x279   : > { %p12_p5 = scmp.ge.s32.totalorder %s15_s20, 4   ;;  %s2931_s19 = smov %s2933_s21 }
 0x27b   :  { %14 = sbr.rel (!%p12_p5) target bundleno = 2 (0x2), region = 78 }

// kernel: efnet_forward.3
= control target key start
LH: loop header
LB: loop body
LE: loop exit
PB: predicated region body
PF: predicated region fallthrough
CT: control target
= control target key end

     0   :  { %v1559_v3 = vmov 0.0   ;;  %vm78_vm0 = vcmask 195584   ;;  %vm1561_vm1 = vmmov 0   ;;  %vm1281_vm2 = vcmask 1024   ;;  %s2755_s2 = inlined_call_operand.vmem [shape: f32[24,512], index: 2, kind: input, shape index: {}]   ;;  %s2756_s1 = inlined_call_operand.vmem [shape: f32[2,24], index: 1, kind: input, shape index: {}]   ;;  %s2757_s4 = inlined_call_operand.vmem [shape: f32[512,256], index: 4, kind: input, shape index: {}]   ;;  %s2758_s7 = inlined_call_operand.vmem [shape: f32[256,128], index: 7, kind: input, shape index: {}]   ;;  %s2759_s6 = inlined_call_operand.vmem [shape: f32[1280,128], index: 6, kind: input, shape index: {}]   ;;  %s2760_s3 = inlined_call_operand.vmem [shape: f32[1,512], index: 3, kind: input, shape index: {}]   ;;  %s2761_s0 = inlined_call_operand.vmem [shape: f32[2,1280], index: 0, kind: input, shape index: {}]   ;;  %s2762_s5 = inlined_call_operand.vmem [shape: f32[1,256], index: 5, kind: input, shape index: {}]   ;;  %s2763_s9 = inlined_call_operand.vmem [shape: f32[128,1], index: 9, kind: input, shape index: {}]   ;;  %s2764_s10 = inlined_call_operand.<no memory space> [shape: f32[1,1], index: 10, kind: input, shape index: {}]   ;;  %s2765_s8 = inlined_call_operand.vmem [shape: f32[1,128], index: 8, kind: input, shape index: {}]   ;;  %s2766_s11 = inlined_call_operand.vmem [shape: f32[2,1], index: 11, kind: output, shape index: {}]  }
   0x1   :  { %v53_v0 = vld [vmem:[%s2755_s2 + $0x48] sm:$0xff]  ;;  %v52_v1 = vld [vmem:[%s2755_s2 + $0x40] sm:$0xff]  ;;  %146 = vmatprep.mubr.f32.mxu1 %v1559_v3  ;;  %v55_v8 = vld [vmem:[%s2755_s2 + $0x58] sm:$0xff] }
   0x2   :  { %v49_v2 = vld [vmem:[%s2755_s2 + $0x28] sm:$0xff]  ;;  %108 = vmatprep.subr.mxu1 %v53_v0  ;;  %v48_v4 = vld [vmem:[%s2755_s2 + $0x20] sm:$0xff]  ;;  %v259_v9 = vld [vmem:[%s2757_s4 + $0xf8] sm:$0xff] }
   0x3   :  { %109 = vmatpush1.msra.mxu1 %v52_v1  ;;  %v45_v5 = vld [vmem:[%s2755_s2 + $0x8] sm:$0xff]  ;;  %v44_v6 = vld [vmem:[%s2755_s2] sm:$0xff]  ;;  %v258_v10 = vld [vmem:[%s2757_s4 + $0xf0] sm:$0xff]  ;;  %368 = vmatprep.subr.mxu0 %v259_v9 }
   0x4   :  { %110 = vmatprep.subr.mxu1 %v49_v2  ;;  %v43_v7 = vld [vmem:[%s2756_s1] sm:$0x3]  ;;  %v54_v11 = vld [vmem:[%s2755_s2 + $0x50] sm:$0xff]  ;;  %v51_v12 = vld [vmem:[%s2755_s2 + $0x38] sm:$0xff]  ;;  %369 = vmatpush1.msra.mxu0 %v258_v10 }
   0x5   :  { %111 = vmatpush1.msra.mxu1 %v48_v4  ;;  %v257_v13 = vld [vmem:[%s2757_s4 + $0xe8] sm:$0xff]  ;;  %v50_v14 = vld [vmem:[%s2755_s2 + $0x30] sm:$0xff]  ;;  %v256_v15 = vld [vmem:[%s2757_s4 + $0xe0] sm:$0xff] }
   0x6   :  { %112 = vmatprep.subr.mxu1 %v45_v5  ;;  %v47_v16 = vld [vmem:[%s2755_s2 + $0x18] sm:$0xff]  ;;  %v46_v18 = vld [vmem:[%s2755_s2 + $0x10] sm:$0xff]  ;;  %370 = vmatprep.subr.mxu0 %v257_v13  ;;  %v253_v20 = vld [vmem:[%s2757_s4 + $0xc8] sm:$0xff] }
   0x7   :  { %113 = vmatpush1.msra.mxu1 %v44_v6  ;;  %v255_v17 = vld [vmem:[%s2757_s4 + $0xd8] sm:$0xff]  ;;  %v254_v19 = vld [vmem:[%s2757_s4 + $0xd0] sm:$0xff]  ;;  %371 = vmatpush1.msra.mxu0 %v256_v15  ;;  %v252_v22 = vld [vmem:[%s2757_s4 + $0xc0] sm:$0xff] }
   0x8   :  { %1287 = vmatmul.mubr.msk.f32.vlgmr.msra.gmra.mxu1 %vm78_vm0, %v43_v7  ;;  %179 = vmatprep.subr.mxu1 %v55_v8  ;;  %v323_v21 = vld [vmem:[%s2757_s4 + $0x2f8] sm:$0xff]  ;;  %v322_v23 = vld [vmem:[%s2757_s4 + $0x2f0] sm:$0xff]  ;;  %v321_v25 = vld [vmem:[%s2757_s4 + $0x2e8] sm:$0xff] }
   0x9   :  { %180 = vmatpush1.msra.mxu1 %v54_v11  ;;  %217 = vmatprep.mubr.f32.mxu1 %v1559_v3  ;;  %v251_v24 = vld [vmem:[%s2757_s4 + $0xb8] sm:$0xff]  ;;  %v250_v26 = vld [vmem:[%s2757_s4 + $0xb0] sm:$0xff]  ;;  %v320_v27 = vld [vmem:[%s2757_s4 + $0x2e0] sm:$0xff] }
   0xa   :  { %181 = vmatprep.subr.mxu1 %v51_v12  ;;  %372 = vmatprep.subr.mxu0 %v255_v17  ;;  %v249_v28 = vld [vmem:[%s2757_s4 + $0xa8] sm:$0xff]  ;;  %v319_v29 = vld [vmem:[%s2757_s4 + $0x2d8] sm:$0xff]  ;;  %v248_v30 = vld [vmem:[%s2757_s4 + $0xa0] sm:$0xff] }
   0xb   :  { %182 = vmatpush1.msra.mxu1 %v50_v14  ;;  %373 = vmatpush1.msra.mxu0 %v254_v19  ;;  %v318_v31 = vld [vmem:[%s2757_s4 + $0x2d0] sm:$0xff]  ;;  %v247_v32 = vld [vmem:[%s2757_s4 + $0x98] sm:$0xff]  ;;  %v317_v33 = vld [vmem:[%s2757_s4 + $0x2c8] sm:$0xff] }
   0xc   :  { %183 = vmatprep.subr.mxu1 %v47_v16  ;;  %374 = vmatprep.subr.mxu0 %v253_v20  ;;  %v246_v34 = vld [vmem:[%s2757_s4 + $0x90] sm:$0xff]  ;;  %v316_v35 = vld [vmem:[%s2757_s4 + $0x2c0] sm:$0xff]  ;;  %v245_v36 = vld [vmem:[%s2757_s4 + $0x88] sm:$0xff] }
   0xd   :  { %184 = vmatpush1.msra.mxu1 %v46_v18  ;;  %375 = vmatpush1.msra.mxu0 %v252_v22  ;;  %v315_v37 = vld [vmem:[%s2757_s4 + $0x2b8] sm:$0xff]  ;;  %v244_v38 = vld [vmem:[%s2757_s4 + $0x80] sm:$0xff]  ;;  %v314_v39 = vld [vmem:[%s2757_s4 + $0x2b0] sm:$0xff] }
   0xe   :  { %1288 = vmatmul.mubr.msk.f32.vlgmr.msra.gmra.mxu1 %vm78_vm0, %v43_v7  ;;  %439 = vmatprep.subr.mxu1 %v323_v21  ;;  %v243_v40 = vld [vmem:[%s2757_s4 + $0x78] sm:$0xff]  ;;  %v313_v41 = vld [vmem:[%s2757_s4 + $0x2a8] sm:$0xff]  ;;  %v242_v42 = vld [vmem:[%s2757_s4 + $0x70] sm:$0xff] }
   0xf   :  { %440 = vmatpush1.msra.mxu1 %v322_v23  ;;  %376 = vmatprep.subr.mxu0 %v251_v24  ;;  %v312_v43 = vld [vmem:[%s2757_s4 + $0x2a0] sm:$0xff]  ;;  %v241_v44 = vld [vmem:[%s2757_s4 + $0x68] sm:$0xff]  ;;  %v311_v45 = vld [vmem:[%s2757_s4 + $0x298] sm:$0xff] }
  0x10   :  { %441 = vmatprep.subr.mxu1 %v321_v25  ;;  %377 = vmatpush1.msra.mxu0 %v250_v26  ;;  %v240_v46 = vld [vmem:[%s2757_s4 + $0x60] sm:$0xff]  ;;  %v310_v47 = vld [vmem:[%s2757_s4 + $0x290] sm:$0xff]  ;;  %v239_v48 = vld [vmem:[%s2757_s4 + $0x58] sm:$0xff] }
  0x11   :  { %442 = vmatpush1.msra.mxu1 %v320_v27  ;;  %378 = vmatprep.subr.mxu0 %v249_v28  ;;  %v309_v49 = vld [vmem:[%s2757_s4 + $0x288] sm:$0xff]  ;;  %v238_v50 = vld [vmem:[%s2757_s4 + $0x50] sm:$0xff]  ;;  %v308_v51 = vld [vmem:[%s2757_s4 + $0x280] sm:$0xff] }
  0x12   :  { %443 = vmatprep.subr.mxu1 %v319_v29  ;;  %379 = vmatpush1.msra.mxu0 %v248_v30  ;;  %v237_v52 = vld [vmem:[%s2757_s4 + $0x48] sm:$0xff]  ;;  %v307_v53 = vld [vmem:[%s2757_s4 + $0x278] sm:$0xff]  ;;  %v236_v54 = vld [vmem:[%s2757_s4 + $0x40] sm:$0xff] }
  0x13   :  { %444 = vmatpush1.msra.mxu1 %v318_v31  ;;  %380 = vmatprep.subr.mxu0 %v247_v32  ;;  %v306_v55 = vld [vmem:[%s2757_s4 + $0x270] sm:$0xff]  ;;  %v235_v56 = vld [vmem:[%s2757_s4 + $0x38] sm:$0xff]  ;;  %v305_v57 = vld [vmem:[%s2757_s4 + $0x268] sm:$0xff] }
  0x14   :  { %445 = vmatprep.subr.mxu1 %v317_v33  ;;  %381 = vmatpush1.msra.mxu0 %v246_v34  ;;  %v234_v58 = vld [vmem:[%s2757_s4 + $0x30] sm:$0xff]  ;;  %v304_v59 = vld [vmem:[%s2757_s4 + $0x260] sm:$0xff]  ;;  %v233_v60 = vld [vmem:[%s2757_s4 + $0x28] sm:$0xff] }
  0x15   :  { %446 = vmatpush1.msra.mxu1 %v316_v35  ;;  %382 = vmatprep.subr.mxu0 %v245_v36  ;;  %v303_v61 = vld [vmem:[%s2757_s4 + $0x258] sm:$0xff]  ;;  %v232_v62 = vld [vmem:[%s2757_s4 + $0x20] sm:$0xff]  ;;  %v302_v63 = vld [vmem:[%s2757_s4 + $0x250] sm:$0xff] }
  0x16   :  { %447 = vmatprep.subr.mxu1 %v315_v37  ;;  %383 = vmatpush1.msra.mxu0 %v244_v38  ;;  %v231_v0 = vld [vmem:[%s2757_s4 + $0x18] sm:$0xff]  ;;  %v301_v1 = vld [vmem:[%s2757_s4 + $0x248] sm:$0xff]  ;;  %v230_v2 = vld [vmem:[%s2757_s4 + $0x10] sm:$0xff] }
  0x17   :  { %448 = vmatpush1.msra.mxu1 %v314_v39  ;;  %384 = vmatprep.subr.mxu0 %v243_v40  ;;  %v300_v4 = vld [vmem:[%s2757_s4 + $0x240] sm:$0xff]  ;;  %v229_v5 = vld [vmem:[%s2757_s4 + $0x8] sm:$0xff]  ;;  %v299_v6 = vld [vmem:[%s2757_s4 + $0x238] sm:$0xff] }
  0x18   :  { %449 = vmatprep.subr.mxu1 %v313_v41  ;;  %385 = vmatpush1.msra.mxu0 %v242_v42  ;;  %v228_v7 = vld [vmem:[%s2757_s4] sm:$0xff]  ;;  %v298_v8 = vld [vmem:[%s2757_s4 + $0x230] sm:$0xff]  ;;  %v291_v9 = vld [vmem:[%s2757_s4 + $0x1f8] sm:$0xff] }
  0x19   :  { %450 = vmatpush1.msra.mxu1 %v312_v43  ;;  %386 = vmatprep.subr.mxu0 %v241_v44  ;;  %v297_v10 = vld [vmem:[%s2757_s4 + $0x228] sm:$0xff]  ;;  %v290_v11 = vld [vmem:[%s2757_s4 + $0x1f0] sm:$0xff]  ;;  %v296_v12 = vld [vmem:[%s2757_s4 + $0x220] sm:$0xff] }
  0x1a   :  { %451 = vmatprep.subr.mxu1 %v311_v45  ;;  %387 = vmatpush1.msra.mxu0 %v240_v46  ;;  %v289_v13 = vld [vmem:[%s2757_s4 + $0x1e8] sm:$0xff]  ;;  %v295_v14 = vld [vmem:[%s2757_s4 + $0x218] sm:$0xff]  ;;  %v288_v15 = vld [vmem:[%s2757_s4 + $0x1e0] sm:$0xff] }
  0x1b   :  { %452 = vmatpush1.msra.mxu1 %v310_v47  ;;  %388 = vmatprep.subr.mxu0 %v239_v48  ;;  %v294_v16 = vld [vmem:[%s2757_s4 + $0x210] sm:$0xff]  ;;  %v287_v17 = vld [vmem:[%s2757_s4 + $0x1d8] sm:$0xff]  ;;  %v293_v18 = vld [vmem:[%s2757_s4 + $0x208] sm:$0xff] }
  0x1c   :  { %453 = vmatprep.subr.mxu1 %v309_v49  ;;  %389 = vmatpush1.msra.mxu0 %v238_v50  ;;  %v286_v19 = vld [vmem:[%s2757_s4 + $0x1d0] sm:$0xff]  ;;  %v292_v20 = vld [vmem:[%s2757_s4 + $0x200] sm:$0xff]  ;;  %v285_v21 = vld [vmem:[%s2757_s4 + $0x1c8] sm:$0xff] }
  0x1d   :  { %454 = vmatpush1.msra.mxu1 %v308_v51  ;;  %390 = vmatprep.subr.mxu0 %v237_v52  ;;  %v355_v22 = vld [vmem:[%s2757_s4 + $0x3f8] sm:$0xff]  ;;  %v284_v23 = vld [vmem:[%s2757_s4 + $0x1c0] sm:$0xff]  ;;  %v354_v24 = vld [vmem:[%s2757_s4 + $0x3f0] sm:$0xff] }
  0x1e   :  { %455 = vmatprep.subr.mxu1 %v307_v53  ;;  %391 = vmatpush1.msra.mxu0 %v236_v54  ;;  %v283_v25 = vld [vmem:[%s2757_s4 + $0x1b8] sm:$0xff]  ;;  %v353_v26 = vld [vmem:[%s2757_s4 + $0x3e8] sm:$0xff]  ;;  %v282_v27 = vld [vmem:[%s2757_s4 + $0x1b0] sm:$0xff] }
  0x1f   :  { %456 = vmatpush1.msra.mxu1 %v306_v55  ;;  %392 = vmatprep.subr.mxu0 %v235_v56  ;;  %v352_v28 = vld [vmem:[%s2757_s4 + $0x3e0] sm:$0xff]  ;;  %v281_v29 = vld [vmem:[%s2757_s4 + $0x1a8] sm:$0xff]  ;;  %v351_v30 = vld [vmem:[%s2757_s4 + $0x3d8] sm:$0xff] }
  0x20   :  { %457 = vmatprep.subr.mxu1 %v305_v57  ;;  %393 = vmatpush1.msra.mxu0 %v234_v58  ;;  %v280_v31 = vld [vmem:[%s2757_s4 + $0x1a0] sm:$0xff]  ;;  %v350_v32 = vld [vmem:[%s2757_s4 + $0x3d0] sm:$0xff]  ;;  %v279_v33 = vld [vmem:[%s2757_s4 + $0x198] sm:$0xff] }
  0x21   :  { %458 = vmatpush1.msra.mxu1 %v304_v59  ;;  %394 = vmatprep.subr.mxu0 %v233_v60  ;;  %v349_v34 = vld [vmem:[%s2757_s4 + $0x3c8] sm:$0xff]  ;;  %v278_v35 = vld [vmem:[%s2757_s4 + $0x190] sm:$0xff]  ;;  %v348_v36 = vld [vmem:[%s2757_s4 + $0x3c0] sm:$0xff] }
  0x22   :  { %459 = vmatprep.subr.mxu1 %v303_v61  ;;  %395 = vmatpush1.msra.mxu0 %v232_v62  ;;  %v277_v37 = vld [vmem:[%s2757_s4 + $0x188] sm:$0xff]  ;;  %v347_v38 = vld [vmem:[%s2757_s4 + $0x3b8] sm:$0xff]  ;;  %v276_v39 = vld [vmem:[%s2757_s4 + $0x180] sm:$0xff] }
  0x23   :  { %460 = vmatpush1.msra.mxu1 %v302_v63  ;;  %396 = vmatprep.subr.mxu0 %v231_v0  ;;  %v346_v40 = vld [vmem:[%s2757_s4 + $0x3b0] sm:$0xff]  ;;  %v275_v41 = vld [vmem:[%s2757_s4 + $0x178] sm:$0xff]  ;;  %v345_v42 = vld [vmem:[%s2757_s4 + $0x3a8] sm:$0xff] }
  0x24   :  { %461 = vmatprep.subr.mxu1 %v301_v1  ;;  %397 = vmatpush1.msra.mxu0 %v230_v2  ;;  %v274_v43 = vld [vmem:[%s2757_s4 + $0x170] sm:$0xff]  ;;  %v344_v44 = vld [vmem:[%s2757_s4 + $0x3a0] sm:$0xff]  ;;  %v273_v45 = vld [vmem:[%s2757_s4 + $0x168] sm:$0xff] }
  0x25   :  { %462 = vmatpush1.msra.mxu1 %v300_v4  ;;  %398 = vmatprep.subr.mxu0 %v229_v5  ;;  %v343_v46 = vld [vmem:[%s2757_s4 + $0x398] sm:$0xff]  ;;  %v272_v47 = vld [vmem:[%s2757_s4 + $0x160] sm:$0xff]  ;;  %v342_v48 = vld [vmem:[%s2757_s4 + $0x390] sm:$0xff] }
  0x26   :  { %463 = vmatprep.subr.mxu1 %v299_v6  ;;  %399 = vmatpush1.msra.mxu0 %v228_v7  ;;  %v271_v49 = vld [vmem:[%s2757_s4 + $0x158] sm:$0xff]  ;;  %v341_v50 = vld [vmem:[%s2757_s4 + $0x388] sm:$0xff]  ;;  %v270_v51 = vld [vmem:[%s2757_s4 + $0x150] sm:$0xff] }
  0x27   :  { %464 = vmatpush1.msra.mxu1 %v298_v8  ;;  %400 = vmatprep.subr.mxu0 %v291_v9  ;;  %v340_v52 = vld [vmem:[%s2757_s4 + $0x380] sm:$0xff]  ;;  %v269_v53 = vld [vmem:[%s2757_s4 + $0x148] sm:$0xff]  ;;  %v339_v54 = vld [vmem:[%s2757_s4 + $0x378] sm:$0xff] }
  0x28   :  { %465 = vmatprep.subr.mxu1 %v297_v10  ;;  %401 = vmatpush2.msra.mxu0 %v290_v11  ;;  %v268_v55 = vld [vmem:[%s2757_s4 + $0x140] sm:$0xff]  ;;  %v338_v56 = vld [vmem:[%s2757_s4 + $0x370] sm:$0xff]  ;;  %v267_v57 = vld [vmem:[%s2757_s4 + $0x138] sm:$0xff] }
  0x29   :  { %466 = vmatpush1.msra.mxu1 %v296_v12  ;;  %402 = vmatprep.subr.mxu0 %v289_v13  ;;  %v337_v58 = vld [vmem:[%s2757_s4 + $0x368] sm:$0xff]  ;;  %v266_v59 = vld [vmem:[%s2757_s4 + $0x130] sm:$0xff]  ;;  %v336_v60 = vld [vmem:[%s2757_s4 + $0x360] sm:$0xff] }
  0x2a   :  { %467 = vmatprep.subr.mxu1 %v295_v14  ;;  %403 = vmatpush2.msra.mxu0 %v288_v15  ;;  %v265_v61 = vld [vmem:[%s2757_s4 + $0x128] sm:$0xff]  ;;  %v335_v62 = vld [vmem:[%s2757_s4 + $0x358] sm:$0xff]  ;;  %v264_v63 = vld [vmem:[%s2757_s4 + $0x120] sm:$0xff] }
  0x2b   :  { %468 = vmatpush1.msra.mxu1 %v294_v16  ;;  %404 = vmatprep.subr.mxu0 %v287_v17  ;;  %v334_v0 = vld [vmem:[%s2757_s4 + $0x350] sm:$0xff]  ;;  %v263_v1 = vld [vmem:[%s2757_s4 + $0x118] sm:$0xff]  ;;  %v333_v2 = vld [vmem:[%s2757_s4 + $0x348] sm:$0xff] }
  0x2c   :  { %469 = vmatprep.subr.mxu1 %v293_v18  ;;  %405 = vmatpush2.msra.mxu0 %v286_v19  ;;  %v262_v4 = vld [vmem:[%s2757_s4 + $0x110] sm:$0xff]  ;;  %v332_v5 = vld [vmem:[%s2757_s4 + $0x340] sm:$0xff]  ;;  %v261_v6 = vld [vmem:[%s2757_s4 + $0x108] sm:$0xff]  ;;  %v58_v18 = vlaneseq }
  0x2d   :  { %470 = vmatpush1.msra.mxu1 %v292_v20  ;;  %406 = vmatprep.subr.mxu0 %v285_v21  ;;  %v331_v7 = vld [vmem:[%s2757_s4 + $0x338] sm:$0xff]  ;;  %v260_v8 = vld [vmem:[%s2757_s4 + $0x100] sm:$0xff]  ;;  %v330_v9 = vld [vmem:[%s2757_s4 + $0x330] sm:$0xff] }
  0x2e   :  { %471 = vmatprep.subr.mxu1 %v355_v22  ;;  %407 = vmatpush2.msra.mxu0 %v284_v23  ;;  %v329_v10 = vld [vmem:[%s2757_s4 + $0x328] sm:$0xff]  ;;  %v328_v11 = vld [vmem:[%s2757_s4 + $0x320] sm:$0xff]  ;;  %v327_v12 = vld [vmem:[%s2757_s4 + $0x318] sm:$0xff]  ;;  %v2055_v19 = vshrl.u32 %v58_v18, 7 }
  0x2f   :  { %472 = vmatpush2.msra.mxu1 %v354_v24  ;;  %408 = vmatprep.subr.mxu0 %v283_v25  ;;  %v326_v13 = vld [vmem:[%s2757_s4 + $0x310] sm:$0xff]  ;;  %v325_v14 = vld [vmem:[%s2757_s4 + $0x308] sm:$0xff]  ;;  %v324_v15 = vld [vmem:[%s2757_s4 + $0x300] sm:$0xff] }
  0x30   :  { %473 = vmatprep.subr.mxu1 %v353_v26  ;;  %409 = vmatpush2.msra.mxu0 %v282_v27  ;;  %v703_v16 = vld [vmem:[%s2758_s7 + $0xf8] sm:$0xff]  ;;  %v60_v20 = vsub.s32 0, %v2055_v19  ;;  %v56_v21 = vld [vmem:[%s2760_s3] sm:$0xf]  ;;  %v64_v22 = vsub.s32 1, %v2055_v19  ;;  %v68_v26 = vsub.s32 2, %v2055_v19 }
  0x31   :  { %474 = vmatpush2.msra.mxu1 %v352_v28  ;;  %410 = vmatprep.subr.mxu0 %v281_v29  ;;  %v543_v17 = vld [vmem:[%s2759_s6 + $0xf8] sm:$0xff]  ;;  %v72_v27 = vsub.s32 3, %v2055_v19  ;;  %v677_v18 = vld [vmem:[%s2758_s7 + $0x28] sm:$0xff] }
  0x32   :  { %475 = vmatprep.subr.mxu1 %v351_v30  ;;  %411 = vmatpush2.msra.mxu0 %v280_v31  ;;  %v61_v23 = vrot.slane %v56_v21, %v60_v20  ;;  %v65_v24 = vrot.slane %v56_v21, %v64_v22  ;;  %v69_v31 = vrot.slane %v56_v21, %v68_v26  ;;  %v516_v26 = vld [vmem:[%s2759_s6 + $0x20] sm:$0xff] }
  0x33   :  { %476 = vmatpush2.msra.mxu1 %v350_v32  ;;  %412 = vmatprep.subr.mxu0 %v279_v33  ;;  %v73_v33 = vrot.slane %v56_v21, %v72_v27  ;;  %v517_v21 = vld [vmem:[%s2759_s6 + $0x28] sm:$0xff]  ;;  %v691_v27 = vld [vmem:[%s2758_s7 + $0x98] sm:$0xff] }
  0x34   :  { %477 = vmatprep.subr.mxu1 %v349_v34  ;;  %413 = vmatpush2.msra.mxu0 %v278_v35 }
  0x35   :  { %478 = vmatpush2.msra.mxu1 %v348_v36  ;;  %414 = vmatprep.subr.mxu0 %v277_v37  ;;  %v687_v36 = vld [vmem:[%s2758_s7 + $0x78] sm:$0xff]  ;;  %v702_v37 = vld [vmem:[%s2758_s7 + $0xf0] sm:$0xff] }
  0x36   :  { %479 = vmatprep.subr.mxu1 %v347_v38  ;;  %415 = vmatpush2.msra.mxu0 %v276_v39 }
  0x37   :  { %480 = vmatpush2.msra.mxu1 %v346_v40  ;;  %416 = vmatprep.subr.mxu0 %v275_v41  ;;  %v686_v40 = vld [vmem:[%s2758_s7 + $0x70] sm:$0xff] }
  0x38   :  { %481 = vmatprep.subr.mxu1 %v345_v42  ;;  %417 = vmatpush2.msra.mxu0 %v274_v43  ;;  %v701_v42 = vld [vmem:[%s2758_s7 + $0xe8] sm:$0xff] }
  0x39   :  { %482 = vmatpush2.msra.mxu1 %v344_v44  ;;  %418 = vmatprep.subr.mxu0 %v273_v45  ;;  %v685_v43 = vld [vmem:[%s2758_s7 + $0x68] sm:$0xff]  ;;  %v700_v45 = vld [vmem:[%s2758_s7 + $0xe0] sm:$0xff] }
  0x3a   :  { %483 = vmatprep.subr.mxu1 %v343_v46  ;;  %419 = vmatpush2.msra.mxu0 %v272_v47  ;;  %v527_v47 = vld [vmem:[%s2759_s6 + $0x78] sm:$0xff] }
  0x3b   :  { %484 = vmatpush2.msra.mxu1 %v342_v48  ;;  %420 = vmatprep.subr.mxu0 %v271_v49  ;;  %v684_v48 = vld [vmem:[%s2758_s7 + $0x60] sm:$0xff]  ;;  %v542_v49 = vld [vmem:[%s2759_s6 + $0xf0] sm:$0xff] }
  0x3c   :  { %485 = vmatprep.subr.mxu1 %v341_v50  ;;  %421 = vmatpush2.msra.mxu0 %v270_v51  ;;  %v699_v50 = vld [vmem:[%s2758_s7 + $0xd8] sm:$0xff]  ;;  %v526_v51 = vld [vmem:[%s2759_s6 + $0x70] sm:$0xff] }
  0x3d   :  { %486 = vmatpush2.msra.mxu1 %v340_v52  ;;  %422 = vmatprep.subr.mxu0 %v269_v53  ;;  %v683_v52 = vld [vmem:[%s2758_s7 + $0x58] sm:$0xff]  ;;  %v541_v53 = vld [vmem:[%s2759_s6 + $0xe8] sm:$0xff] }
  0x3e   :  { %487 = vmatprep.subr.mxu1 %v339_v54  ;;  %423 = vmatpush2.msra.mxu0 %v268_v55  ;;  %v698_v54 = vld [vmem:[%s2758_s7 + $0xd0] sm:$0xff]  ;;  %v525_v55 = vld [vmem:[%s2759_s6 + $0x68] sm:$0xff] }
  0x3f   :  { %488 = vmatpush2.msra.mxu1 %v338_v56  ;;  %424 = vmatprep.subr.mxu0 %v267_v57  ;;  %v682_v56 = vld [vmem:[%s2758_s7 + $0x50] sm:$0xff]  ;;  %v540_v57 = vld [vmem:[%s2759_s6 + $0xe0] sm:$0xff] }
  0x40   :  { %489 = vmatprep.subr.mxu1 %v337_v58  ;;  %425 = vmatpush2.msra.mxu0 %v266_v59  ;;  %v697_v58 = vld [vmem:[%s2758_s7 + $0xc8] sm:$0xff]  ;;  %v524_v59 = vld [vmem:[%s2759_s6 + $0x60] sm:$0xff] }
  0x41   :  { %490 = vmatpush2.msra.mxu1 %v336_v60  ;;  %426 = vmatprep.subr.mxu0 %v265_v61  ;;  %v681_v60 = vld [vmem:[%s2758_s7 + $0x48] sm:$0xff]  ;;  %v539_v61 = vld [vmem:[%s2759_s6 + $0xd8] sm:$0xff] }
  0x42   :  { %491 = vmatprep.subr.mxu1 %v335_v62  ;;  %427 = vmatpush2.msra.mxu0 %v264_v63  ;;  %v696_v62 = vld [vmem:[%s2758_s7 + $0xc0] sm:$0xff]  ;;  %v523_v63 = vld [vmem:[%s2759_s6 + $0x58] sm:$0xff] }
  0x43   :  { %492 = vmatpush2.msra.mxu1 %v334_v0  ;;  %428 = vmatprep.subr.mxu0 %v263_v1  ;;  %v680_v0 = vld [vmem:[%s2758_s7 + $0x40] sm:$0xff]  ;;  %v538_v1 = vld [vmem:[%s2759_s6 + $0xd0] sm:$0xff] }
  0x44   :  { %493 = vmatprep.subr.mxu1 %v333_v2  ;;  %429 = vmatpush2.msra.mxu0 %v262_v4  ;;  %v695_v2 = vld [vmem:[%s2758_s7 + $0xb8] sm:$0xff]  ;;  %v522_v4 = vld [vmem:[%s2759_s6 + $0x50] sm:$0xff] }
  0x45   :  { %494 = vmatpush2.msra.mxu1 %v332_v5  ;;  %430 = vmatprep.subr.mxu0 %v261_v6  ;;  %v679_v5 = vld [vmem:[%s2758_s7 + $0x38] sm:$0xff]  ;;  %v537_v6 = vld [vmem:[%s2759_s6 + $0xc8] sm:$0xff] }
  0x46   :  { %495 = vmatprep.subr.mxu1 %v331_v7  ;;  %431 = vmatpush2.msra.mxu0 %v260_v8  ;;  %v694_v7 = vld [vmem:[%s2758_s7 + $0xb0] sm:$0xff]  ;;  %v521_v8 = vld [vmem:[%s2759_s6 + $0x48] sm:$0xff] }
  0x47   :  { %496 = vmatpush2.msra.mxu1 %v330_v9  ;;  %1292 = vmatprep.subr.mxu0 %v703_v16  ;;  %v536_v9 = vld [vmem:[%s2759_s6 + $0xc0] sm:$0xff]  ;;  %v693_v16 = vld [vmem:[%s2758_s7 + $0xa8] sm:$0xff] }
  0x48   :  { %497 = vmatprep.subr.mxu1 %v329_v10  ;;  %v520_v10 = vld [vmem:[%s2759_s6 + $0x40] sm:$0xff] }
  0x49   :  { %498 = vmatpush2.msra.mxu1 %v328_v11  ;;  %v535_v11 = vld [vmem:[%s2759_s6 + $0xb8] sm:$0xff] }
  0x4a   :  { %499 = vmatprep.subr.mxu1 %v327_v12  ;;  %v519_v12 = vld [vmem:[%s2759_s6 + $0x38] sm:$0xff] }
  0x4b   :  { %500 = vmatpush2.msra.mxu1 %v326_v13  ;;  %v534_v13 = vld [vmem:[%s2759_s6 + $0xb0] sm:$0xff] }
  0x4c   :  { %501 = vmatprep.subr.mxu1 %v325_v14  ;;  %v678_v14 = vld [vmem:[%s2758_s7 + $0x30] sm:$0xff] }
  0x4d   :  { %502 = vmatpush2.msra.mxu1 %v324_v15  ;;  %v518_v15 = vld [vmem:[%s2759_s6 + $0x30] sm:$0xff] }
  0x4e   :  { %1327 = vmatprep.subr.mxu1 %v543_v17  ;;  %v533_v17 = vld [vmem:[%s2759_s6 + $0xa8] sm:$0xff] }
  0xc8   :  { %v148_v25 = vpop.f32.mrf.mxu1 }
  0xc9   :  { %v149_v28 = vadd.f32 %v148_v25, %v61_v23  ;;  %v692_v23 = vld [vmem:[%s2758_s7 + $0xa0] sm:$0xff] }
  0xca   :  { %v150_v29 = vpop.f32.mrf.mxu1  ;;  %v676_v25 = vld [vmem:[%s2758_s7 + $0x20] sm:$0xff] }
  0xcb   :  { %v151_v30 = vadd.f32 %v150_v29, %v65_v24  ;;  %v224_v34 = vmax.f32 %v149_v28, 0.0  ;;  %v532_v24 = vld [vmem:[%s2759_s6 + $0xa0] sm:$0xff]  ;;  %v1560_v28 = vmov 1983009808  }
  0xcc   :  { %v779_v29 = vunpack.c.l.s4 %v1560_v28  ;;  %v671_v28 = vld [vmem:[%s2759_s6 + $0x4f8] sm:$0xff] }
  0xcd   :  { %v225_v32 = vmax.f32 %v151_v30, 0.0  ;;  %v531_v30 = vld [vmem:[%s2759_s6 + $0x98] sm:$0xff] }
  0xce   :  { %v219_v35 = vpop.f32.mrf.mxu1 }
  0xcf   :  { %432 = vmatprep.mubr.f32.mxu0 %v225_v32  ;;  %v220_v38 = vadd.f32 %v219_v35, %v69_v31  ;;  %v675_v31 = vld [vmem:[%s2758_s7 + $0x18] sm:$0xff]  ;;  %v530_v35 = vld [vmem:[%s2759_s6 + $0x90] sm:$0xff] }
  0xd0   :  { %v221_v39 = vpop.f32.mrf.mxu1  ;;  %433 = vmatmul.mubr.f32.vlgmr.msra.gmra.mxu0 %v224_v34  ;;  %v515_v32 = vld [vmem:[%s2759_s6 + $0x18] sm:$0xff]  ;;  %v690_v34 = vld [vmem:[%s2758_s7 + $0x90] sm:$0xff] }
  0xd1   :  { %v222_v41 = vadd.f32 %v221_v39, %v73_v33  ;;  %1293 = vmatpush3.msra.mxu0 %v687_v36  ;;  %v226_v46 = vmax.f32 %v220_v38, 0.0  ;;  %v780_v33 = vunpack.c.0.s8 %v779_v29  ;;  %v674_v36 = vld [vmem:[%s2758_s7 + $0x10] sm:$0xff]  ;;  %v689_v39 = vld [vmem:[%s2758_s7 + $0x88] sm:$0xff]  ;;  %v655_v29 = vld [vmem:[%s2759_s6 + $0x478] sm:$0xff] }
  0xd2   :  { %1294 = vmatprep.subr.mxu0 %v702_v37  ;;  %v514_v37 = vld [vmem:[%s2759_s6 + $0x10] sm:$0xff] }
  0xd3   :  { %v227_v44 = vmax.f32 %v222_v41, 0.0  ;;  %1295 = vmatpush3.msra.mxu0 %v686_v40  ;;  %v2231_v38 = vsub.s32 %v780_v33, %v2055_v19  ;;  %v529_v40 = vld [vmem:[%s2759_s6 + $0x88] sm:$0xff]  ;;  %v2242_v41 = vld [vmem:[%s2761_s0] sm:$0xff]  ;;  %v574_v19 = vld [vmem:[%s2759_s6 + $0x1f0] sm:$0xff] }
  0xd4   :  { %1296 = vmatprep.subr.mxu0 %v701_v42  ;;  %v673_v42 = vld [vmem:[%s2758_s7 + $0x8] sm:$0xff] }
  0xd5   :  { %503 = vmatprep.mubr.f32.mxu1 %v227_v44  ;;  %1297 = vmatpush3.msra.mxu0 %v685_v43  ;;  %v513_v43 = vld [vmem:[%s2759_s6 + $0x8] sm:$0xff]  ;;  %v784_v44 = vrot.slane %v2242_v41, %v2231_v38 }
  0xd6   :  { %504 = vmatmul.mubr.f32.vlgmr.msra.gmra.mxu1 %v226_v46  ;;  %1298 = vmatprep.subr.mxu0 %v700_v45  ;;  %v688_v45 = vld [vmem:[%s2758_s7 + $0x80] sm:$0xff]  ;;  %v653_v33 = vld [vmem:[%s2759_s6 + $0x468] sm:$0xff] }
  0xd7   :  { %1328 = vmatpush3.msra.mxu1 %v527_v47  ;;  %1299 = vmatpush3.msra.mxu0 %v684_v48  ;;  %v528_v46 = vld [vmem:[%s2759_s6 + $0x80] sm:$0xff] }
  0xd8   :  { %1329 = vmatprep.subr.mxu1 %v542_v49  ;;  %1300 = vmatprep.subr.mxu0 %v699_v50  ;;  %v672_v47 = vld [vmem:[%s2758_s7] sm:$0xff]  ;;  %v792_v49 = vcombine.high %v784_v44, %v784_v44  ;;  %v575_v50 = vld [vmem:[%s2759_s6 + $0x1f8] sm:$0xff] }
  0xd9   :  { %1330 = vmatpush3.msra.mxu1 %v526_v51  ;;  %1301 = vmatpush3.msra.mxu0 %v683_v52  ;;  %v512_v48 = vld [vmem:[%s2759_s6] sm:$0xff]  ;;  %v607_v51 = vld [vmem:[%s2759_s6 + $0x2f8] sm:$0xff] }
  0xda   :  { %1331 = vmatprep.subr.mxu1 %v541_v53  ;;  %1302 = vmatprep.subr.mxu0 %v698_v54  ;;  %v591_v52 = vld [vmem:[%s2759_s6 + $0x278] sm:$0xff]  ;;  %v606_v53 = vld [vmem:[%s2759_s6 + $0x2f0] sm:$0xff] }
  0xdb   :  { %1332 = vmatpush3.msra.mxu1 %v525_v55  ;;  %1303 = vmatpush3.msra.mxu0 %v682_v56  ;;  %v590_v54 = vld [vmem:[%s2759_s6 + $0x270] sm:$0xff]  ;;  %v605_v55 = vld [vmem:[%s2759_s6 + $0x2e8] sm:$0xff] }
  0xdc   :  { %1333 = vmatprep.subr.mxu1 %v540_v57  ;;  %1304 = vmatprep.subr.mxu0 %v697_v58  ;;  %v589_v56 = vld [vmem:[%s2759_s6 + $0x268] sm:$0xff]  ;;  %v604_v57 = vld [vmem:[%s2759_s6 + $0x2e0] sm:$0xff] }
  0xdd   :  { %1334 = vmatpush3.msra.mxu1 %v524_v59  ;;  %1305 = vmatpush3.msra.mxu0 %v681_v60  ;;  %v588_v58 = vld [vmem:[%s2759_s6 + $0x260] sm:$0xff]  ;;  %v603_v59 = vld [vmem:[%s2759_s6 + $0x2d8] sm:$0xff] }
  0xde   :  { %1335 = vmatprep.subr.mxu1 %v539_v61  ;;  %1306 = vmatprep.subr.mxu0 %v696_v62  ;;  %v587_v60 = vld [vmem:[%s2759_s6 + $0x258] sm:$0xff]  ;;  %v602_v61 = vld [vmem:[%s2759_s6 + $0x2d0] sm:$0xff] }
  0xdf   :  { %1336 = vmatpush3.msra.mxu1 %v523_v63  ;;  %1307 = vmatpush3.msra.mxu0 %v680_v0  ;;  %v586_v62 = vld [vmem:[%s2759_s6 + $0x250] sm:$0xff]  ;;  %v601_v63 = vld [vmem:[%s2759_s6 + $0x2c8] sm:$0xff] }
  0xe0   :  { %1337 = vmatprep.subr.mxu1 %v538_v1  ;;  %1308 = vmatprep.subr.mxu0 %v695_v2  ;;  %v585_v0 = vld [vmem:[%s2759_s6 + $0x248] sm:$0xff]  ;;  %v600_v1 = vld [vmem:[%s2759_s6 + $0x2c0] sm:$0xff] }
  0xe1   :  { %1338 = vmatpush3.msra.mxu1 %v522_v4  ;;  %1309 = vmatpush3.msra.mxu0 %v679_v5  ;;  %v584_v2 = vld [vmem:[%s2759_s6 + $0x240] sm:$0xff]  ;;  %v599_v4 = vld [vmem:[%s2759_s6 + $0x2b8] sm:$0xff] }
  0xe2   :  { %1339 = vmatprep.subr.mxu1 %v537_v6  ;;  %1310 = vmatprep.subr.mxu0 %v694_v7  ;;  %v583_v5 = vld [vmem:[%s2759_s6 + $0x238] sm:$0xff]  ;;  %v598_v6 = vld [vmem:[%s2759_s6 + $0x2b0] sm:$0xff] }
  0xe3   :  { %1340 = vmatpush3.msra.mxu1 %v521_v8  ;;  %1311 = vmatpush3.msra.mxu0 %v678_v14  ;;  %v582_v7 = vld [vmem:[%s2759_s6 + $0x230] sm:$0xff]  ;;  %v597_v8 = vld [vmem:[%s2759_s6 + $0x2a8] sm:$0xff] }
  0xe4   :  { %1341 = vmatprep.subr.mxu1 %v536_v9  ;;  %1312 = vmatprep.subr.mxu0 %v693_v16  ;;  %v581_v9 = vld [vmem:[%s2759_s6 + $0x228] sm:$0xff]  ;;  %v594_v14 = vld [vmem:[%s2759_s6 + $0x290] sm:$0xff] }
  0xe5   :  { %1342 = vmatpush3.msra.mxu1 %v520_v10  ;;  %1313 = vmatpush3.msra.mxu0 %v677_v18  ;;  %v596_v10 = vld [vmem:[%s2759_s6 + $0x2a0] sm:$0xff]  ;;  %v578_v16 = vld [vmem:[%s2759_s6 + $0x210] sm:$0xff] }
  0xe6   :  { %1343 = vmatprep.subr.mxu1 %v535_v11  ;;  %1314 = vmatprep.subr.mxu0 %v692_v23  ;;  %v580_v11 = vld [vmem:[%s2759_s6 + $0x220] sm:$0xff]  ;;  %v577_v23 = vld [vmem:[%s2759_s6 + $0x208] sm:$0xff] }
  0xe7   :  { %1344 = vmatpush3.msra.mxu1 %v519_v12  ;;  %1315 = vmatpush3.msra.mxu0 %v676_v25  ;;  %v595_v12 = vld [vmem:[%s2759_s6 + $0x298] sm:$0xff]  ;;  %v592_v25 = vld [vmem:[%s2759_s6 + $0x280] sm:$0xff] }
  0xe8   :  { %1345 = vmatprep.subr.mxu1 %v534_v13  ;;  %1316 = vmatprep.subr.mxu0 %v691_v27  ;;  %v579_v13 = vld [vmem:[%s2759_s6 + $0x218] sm:$0xff] }
  0xe9   :  { %1346 = vmatpush3.msra.mxu1 %v518_v15  ;;  %1317 = vmatpush3.msra.mxu0 %v675_v31  ;;  %v777_v15 = vcombine.high %v2242_v41, %v2242_v41  ;;  %v654_v31 = vld [vmem:[%s2759_s6 + $0x470] sm:$0xff]  ;;  %v665_v41 = vld [vmem:[%s2759_s6 + $0x4c8] sm:$0xff] }
  0xea   :  { %1347 = vmatprep.subr.mxu1 %v533_v17  ;;  %1318 = vmatprep.subr.mxu0 %v690_v34  ;;  %v593_v17 = vld [vmem:[%s2759_s6 + $0x288] sm:$0xff]  ;;  %v668_v34 = vld [vmem:[%s2759_s6 + $0x4e0] sm:$0xff] }
  0xeb   :  { %1348 = vmatpush3.msra.mxu1 %v517_v21  ;;  %1319 = vmatpush3.msra.mxu0 %v674_v36  ;;  %v2357_v18 = vrot.slane %v777_v15, %v2231_v38  ;;  %v2362_v21 = vld [vmem:[%s2761_s0 + $0x8] sm:$0xff]  ;;  %v667_v36 = vld [vmem:[%s2759_s6 + $0x4d8] sm:$0xff] }
  0xec   :  { %1349 = vmatprep.subr.mxu1 %v532_v24  ;;  %1320 = vmatprep.subr.mxu0 %v689_v39  ;;  %v801_v24 = vrot.slane %v2362_v21, %v2231_v38  ;;  %v666_v39 = vld [vmem:[%s2759_s6 + $0x4d0] sm:$0xff]  ;;  %v559_v15 = vld [vmem:[%s2759_s6 + $0x178] sm:$0xff] }
  0xed   :  { %1350 = vmatpush3.msra.mxu1 %v516_v26  ;;  %1321 = vmatpush3.msra.mxu0 %v673_v42  ;;  %v576_v26 = vld [vmem:[%s2759_s6 + $0x200] sm:$0xff]  ;;  %v649_v42 = vld [vmem:[%s2759_s6 + $0x448] sm:$0xff] }
  0xee   :  { %1351 = vmatprep.subr.mxu1 %v531_v30  ;;  %1322 = vmatprep.subr.mxu0 %v688_v45  ;;  %v809_v27 = vcombine.high %v801_v24, %v801_v24  ;;  %v670_v30 = vld [vmem:[%s2759_s6 + $0x4f0] sm:$0xff]  ;;  %v663_v45 = vld [vmem:[%s2759_s6 + $0x4b8] sm:$0xff] }
  0xef   :  { %1352 = vmatpush3.msra.mxu1 %v515_v32  ;;  %1323 = vmatpush3.msra.mxu0 %v672_v47  ;;  %v669_v32 = vld [vmem:[%s2759_s6 + $0x4e8] sm:$0xff]  ;;  %v662_v47 = vld [vmem:[%s2759_s6 + $0x4b0] sm:$0xff] }
  0xf0   :  { %1353 = vmatprep.subr.mxu1 %v530_v35  ;;  %893 = vmatprep.mubr.f32.mxu1 %v792_v49  ;;  %v652_v35 = vld [vmem:[%s2759_s6 + $0x460] sm:$0xff]  ;;  %v661_v49 = vld [vmem:[%s2759_s6 + $0x4a8] sm:$0xff] }
  0xf1   :  { %1354 = vmatpush3.msra.mxu1 %v514_v37  ;;  %1362 = vmatprep.subr.mxu0 %v575_v50  ;;  %v651_v37 = vld [vmem:[%s2759_s6 + $0x458] sm:$0xff]  ;;  %v645_v50 = vld [vmem:[%s2759_s6 + $0x428] sm:$0xff] }
  0xf2   :  { %1355 = vmatprep.subr.mxu1 %v529_v40  ;;  %v650_v40 = vld [vmem:[%s2759_s6 + $0x450] sm:$0xff] }
  0xf3   :  { %1356 = vmatpush3.msra.mxu1 %v513_v43  ;;  %v664_v43 = vld [vmem:[%s2759_s6 + $0x4c0] sm:$0xff] }
  0xf4   :  { %1357 = vmatprep.subr.mxu1 %v528_v46  ;;  %v647_v46 = vld [vmem:[%s2759_s6 + $0x438] sm:$0xff] }
  0xf5   :  { %1358 = vmatpush3.msra.mxu1 %v512_v48  ;;  %v646_v48 = vld [vmem:[%s2759_s6 + $0x430] sm:$0xff] }
  0xf6   :  { %1397 = vmatprep.subr.mxu1 %v607_v51  ;;  %894 = vmatmul.mubr.f32.vlgmr.msra.gmra.mxu1 %v784_v44  ;;  %v648_v44 = vld [vmem:[%s2759_s6 + $0x440] sm:$0xff] }
  0xf7   :  { %1398 = vmatpush3.msra.mxu1 %v591_v52  ;;  %1033 = vmatprep.mubr.f32.mxu1 %v809_v27  ;;  %v660_v51 = vld [vmem:[%s2759_s6 + $0x4a0] sm:$0xff]  ;;  %v569_v27 = vld [vmem:[%s2759_s6 + $0x1c8] sm:$0xff] }
  0xf8   :  { %1399 = vmatprep.subr.mxu1 %v606_v53  ;;  %v644_v52 = vld [vmem:[%s2759_s6 + $0x420] sm:$0xff]  ;;  %v659_v53 = vld [vmem:[%s2759_s6 + $0x498] sm:$0xff] }
  0xf9   :  { %1400 = vmatpush3.msra.mxu1 %v590_v54  ;;  %v643_v54 = vld [vmem:[%s2759_s6 + $0x418] sm:$0xff] }
  0xfa   :  { %1401 = vmatprep.subr.mxu1 %v605_v55  ;;  %v658_v55 = vld [vmem:[%s2759_s6 + $0x490] sm:$0xff] }
  0xfb   :  { %1402 = vmatpush3.msra.mxu1 %v589_v56  ;;  %v794_v56 = vcombine.high %v2362_v21, %v2362_v21  ;;  %v556_v21 = vld [vmem:[%s2759_s6 + $0x160] sm:$0xff] }
  0xfc   :  { %1403 = vmatprep.subr.mxu1 %v604_v57  ;;  %v642_v57 = vld [vmem:[%s2759_s6 + $0x410] sm:$0xff] }
  0xfd   :  { %1404 = vmatpush3.msra.mxu1 %v588_v58  ;;  %v657_v58 = vld [vmem:[%s2759_s6 + $0x488] sm:$0xff] }
  0xfe   :  { %1405 = vmatprep.subr.mxu1 %v603_v59  ;;  %v2465_v59 = vrot.slane %v794_v56, %v2231_v38  ;;  %v640_v38 = vld [vmem:[%s2759_s6 + $0x400] sm:$0xff]  ;;  %v635_v56 = vld [vmem:[%s2759_s6 + $0x3d8] sm:$0xff] }
  0xff   :  { %1406 = vmatpush3.msra.mxu1 %v587_v60  ;;  %v641_v60 = vld [vmem:[%s2759_s6 + $0x408] sm:$0xff] }
 0x100   :  { %1407 = vmatprep.subr.mxu1 %v602_v61  ;;  %v1289_v61 = vld.sshfl [vmem:[%s2761_s0 + $0x10] sm:$0x33 pattern:$0x76325410] }
 0x101   :  { %1408 = vmatpush3.msra.mxu1 %v586_v62  ;;  %v656_v62 = vld [vmem:[%s2759_s6 + $0x480] sm:$0xff] }
 0x102   :  { %1409 = vmatprep.subr.mxu1 %v601_v63  ;;  %v818_v63 = vcombine.high %v1289_v61, %v1289_v61 }
 0x103   :  { %1410 = vmatpush3.msra.mxu1 %v585_v0  ;;  %v356_v0 = vld [vmem:[%s2762_s5] sm:$0x3] }
 0x104   :  { %1411 = vmatprep.subr.mxu1 %v600_v1 }
 0x105   :  { %1412 = vmatpush3.msra.mxu1 %v584_v2  ;;  %v361_v2 = vrot.slane %v356_v0, %v60_v20  ;;  %v558_v20 = vld [vmem:[%s2759_s6 + $0x170] sm:$0xff] }
 0x106   :  { %1413 = vmatprep.subr.mxu1 %v599_v4  ;;  %v365_v4 = vrot.slane %v356_v0, %v64_v22  ;;  %v573_v22 = vld [vmem:[%s2759_s6 + $0x1e8] sm:$0xff]  ;;  %v631_v0 = vld [vmem:[%s2759_s6 + $0x3b8] sm:$0xff] }
 0x107   :  { %1414 = vmatpush3.msra.mxu1 %v583_v5 }
 0x108   :  { %1415 = vmatprep.subr.mxu1 %v598_v6 }
 0x109   :  { %1416 = vmatpush3.msra.mxu1 %v582_v7 }
 0x10a   :  { %1417 = vmatprep.subr.mxu1 %v597_v8 }
 0x10b   :  { %1418 = vmatpush3.msra.mxu1 %v581_v9 }
 0x10c   :  { %1419 = vmatprep.subr.mxu1 %v596_v10 }
 0x10d   :  { %1420 = vmatpush3.msra.mxu1 %v580_v11 }
 0x10e   :  { %1421 = vmatprep.subr.mxu1 %v595_v12 }
 0x10f   :  { %1422 = vmatpush3.msra.mxu1 %v579_v13  ;;  %v793_v13 = vcombine.high %v2357_v18, %v2357_v18 }
 0x110   :  { %1423 = vmatprep.subr.mxu1 %v594_v14 }
 0x111   :  { %1424 = vmatpush3.msra.mxu1 %v578_v16  ;;  %v557_v16 = vld [vmem:[%s2759_s6 + $0x168] sm:$0xff] }
 0x112   :  { %1425 = vmatprep.subr.mxu1 %v593_v17  ;;  %v572_v17 = vld [vmem:[%s2759_s6 + $0x1e0] sm:$0xff] }
 0x113   :  { %1426 = vmatpush3.msra.mxu1 %v577_v23  ;;  %v571_v23 = vld [vmem:[%s2759_s6 + $0x1d8] sm:$0xff] }
 0x114   :  { %1427 = vmatprep.subr.mxu1 %v592_v25  ;;  %v570_v25 = vld [vmem:[%s2759_s6 + $0x1d0] sm:$0xff] }
 0x115   :  { %1428 = vmatpush3.msra.mxu1 %v576_v26  ;;  %v554_v26 = vld [vmem:[%s2759_s6 + $0x150] sm:$0xff] }
 0x116   :  { %1467 = vmatprep.subr.mxu1 %v671_v28  ;;  %1034 = vmatmul.mubr.f32.vlgmr.msra.gmra.mxu1 %v801_v24  ;;  %v555_v24 = vld [vmem:[%s2759_s6 + $0x158] sm:$0xff]  ;;  %v553_v28 = vld [vmem:[%s2759_s6 + $0x148] sm:$0xff] }
 0x117   :  { %1468 = vmatpush3.msra.mxu1 %v655_v29  ;;  %1173 = vmatprep.mubr.f32.mxu1 %v818_v63  ;;  %v568_v29 = vld [vmem:[%s2759_s6 + $0x1c0] sm:$0xff] }
 0x118   :  { %1469 = vmatprep.subr.mxu1 %v670_v30  ;;  %v552_v30 = vld [vmem:[%s2759_s6 + $0x140] sm:$0xff] }
 0x119   :  { %1470 = vmatpush3.msra.mxu1 %v654_v31  ;;  %v567_v31 = vld [vmem:[%s2759_s6 + $0x1b8] sm:$0xff]  ;;  %v632_v63 = vld [vmem:[%s2759_s6 + $0x3c0] sm:$0xff] }
 0x11a   :  { %1471 = vmatprep.subr.mxu1 %v669_v32  ;;  %v551_v32 = vld [vmem:[%s2759_s6 + $0x138] sm:$0xff] }
 0x11b   :  { %1472 = vmatpush3.msra.mxu1 %v653_v33  ;;  %v566_v33 = vld [vmem:[%s2759_s6 + $0x1b0] sm:$0xff] }
 0x11c   :  { %1473 = vmatprep.subr.mxu1 %v668_v34  ;;  %v550_v34 = vld [vmem:[%s2759_s6 + $0x130] sm:$0xff] }
 0x11d   :  { %1474 = vmatpush3.msra.mxu1 %v652_v35  ;;  %v565_v35 = vld [vmem:[%s2759_s6 + $0x1a8] sm:$0xff] }
 0x11e   :  { %1475 = vmatprep.subr.mxu1 %v667_v36  ;;  %v549_v36 = vld [vmem:[%s2759_s6 + $0x128] sm:$0xff] }
 0x11f   :  { %1476 = vmatpush3.msra.mxu1 %v651_v37  ;;  %v564_v37 = vld [vmem:[%s2759_s6 + $0x1a0] sm:$0xff] }
 0x120   :  { %1477 = vmatprep.subr.mxu1 %v666_v39  ;;  %v548_v39 = vld [vmem:[%s2759_s6 + $0x120] sm:$0xff] }
 0x121   :  { %1478 = vmatpush3.msra.mxu1 %v650_v40  ;;  %v563_v40 = vld [vmem:[%s2759_s6 + $0x198] sm:$0xff] }
 0x122   :  { %1479 = vmatprep.subr.mxu1 %v665_v41  ;;  %v547_v41 = vld [vmem:[%s2759_s6 + $0x118] sm:$0xff] }
 0x123   :  { %1480 = vmatpush3.msra.mxu1 %v649_v42  ;;  %v562_v42 = vld [vmem:[%s2759_s6 + $0x190] sm:$0xff] }
 0x124   :  { %1481 = vmatprep.subr.mxu1 %v664_v43  ;;  %v546_v43 = vld [vmem:[%s2759_s6 + $0x110] sm:$0xff] }
 0x125   :  { %1482 = vmatpush3.msra.mxu1 %v648_v44  ;;  %v561_v44 = vld [vmem:[%s2759_s6 + $0x188] sm:$0xff] }
 0x126   :  { %1483 = vmatprep.subr.mxu1 %v663_v45  ;;  %v545_v45 = vld [vmem:[%s2759_s6 + $0x108] sm:$0xff] }
 0x127   :  { %1484 = vmatpush3.msra.mxu1 %v647_v46  ;;  %v560_v46 = vld [vmem:[%s2759_s6 + $0x180] sm:$0xff] }
 0x128   :  { %1485 = vmatprep.subr.mxu1 %v662_v47  ;;  %v544_v47 = vld [vmem:[%s2759_s6 + $0x100] sm:$0xff] }
 0x129   :  { %1486 = vmatpush3.msra.mxu1 %v646_v48  ;;  %v639_v48 = vld [vmem:[%s2759_s6 + $0x3f8] sm:$0xff] }
 0x12a   :  { %1487 = vmatprep.subr.mxu1 %v661_v49  ;;  %v810_v49 = vcombine.high %v2465_v59, %v2465_v59 }
 0x12b   :  { %1488 = vmatpush3.msra.mxu1 %v645_v50  ;;  %v623_v50 = vld [vmem:[%s2759_s6 + $0x378] sm:$0xff] }
 0x12c   :  { %1489 = vmatprep.subr.mxu1 %v660_v51  ;;  %v638_v51 = vld [vmem:[%s2759_s6 + $0x3f0] sm:$0xff] }
 0x12d   :  { %1490 = vmatpush3.msra.mxu1 %v644_v52  ;;  %v622_v52 = vld [vmem:[%s2759_s6 + $0x370] sm:$0xff] }
 0x12e   :  { %1491 = vmatprep.subr.mxu1 %v659_v53  ;;  %v637_v53 = vld [vmem:[%s2759_s6 + $0x3e8] sm:$0xff] }
 0x12f   :  { %1492 = vmatpush3.msra.mxu1 %v643_v54  ;;  %v621_v54 = vld [vmem:[%s2759_s6 + $0x368] sm:$0xff] }
 0x130   :  { %1493 = vmatprep.subr.mxu1 %v658_v55  ;;  %v620_v55 = vld [vmem:[%s2759_s6 + $0x360] sm:$0xff] }
 0x131   :  { %1494 = vmatpush3.msra.mxu1 %v642_v57  ;;  %v619_v57 = vld [vmem:[%s2759_s6 + $0x358] sm:$0xff] }
 0x132   :  { %1495 = vmatprep.subr.mxu1 %v657_v58  ;;  %v634_v58 = vld [vmem:[%s2759_s6 + $0x3d0] sm:$0xff] }
 0x133   :  { %1496 = vmatpush3.msra.mxu1 %v641_v60  ;;  %v618_v60 = vld [vmem:[%s2759_s6 + $0x350] sm:$0xff] }
 0x134   :  { %1497 = vmatprep.subr.mxu1 %v656_v62  ;;  %v617_v62 = vld [vmem:[%s2759_s6 + $0x348] sm:$0xff] }
 0x135   :  { %1498 = vmatpush3.msra.mxu1 %v640_v38  ;;  %v616_v38 = vld [vmem:[%s2759_s6 + $0x340] sm:$0xff] }
 0x136   :  { %1174 = vmatmul.mubr.f32.vlgmr.msra.gmra.mxu1 %v1289_v61  ;;  %v633_v61 = vld [vmem:[%s2759_s6 + $0x3c8] sm:$0xff] }
 0x190   :  { %v434_v1 = vpop.f32.mrf.mxu0 }
 0x191   :  { %v435_v6 = vadd.f32 %v434_v1, %v361_v2  ;;  %v615_v1 = vld [vmem:[%s2759_s6 + $0x338] sm:$0xff]  ;;  %v630_v2 = vld [vmem:[%s2759_s6 + $0x3b0] sm:$0xff] }
 0x192   :  { %v436_v5 = vpop.f32.mrf.mxu0 }
 0x193   :  { %v437_v8 = vadd.f32 %v436_v5, %v365_v4  ;;  %v614_v4 = vld [vmem:[%s2759_s6 + $0x330] sm:$0xff]  ;;  %v629_v5 = vld [vmem:[%s2759_s6 + $0x3a8] sm:$0xff] }
 0x196   :  { %v505_v7 = vpop.f32.mrf.mxu1 }
 0x197   :  { %v506_v9 = vadd.f32 %v505_v7, %v435_v6  ;;  %v613_v6 = vld [vmem:[%s2759_s6 + $0x328] sm:$0xff]  ;;  %v628_v7 = vld [vmem:[%s2759_s6 + $0x3a0] sm:$0xff] }
 0x198   :  { %v507_v10 = vpop.f32.mrf.mxu1 }
 0x199   :  { %v508_v11 = vadd.f32 %v507_v10, %v437_v8  ;;  %v510_v14 = vmax.f32 %v506_v9, 0.0  ;;  %v612_v8 = vld [vmem:[%s2759_s6 + $0x320] sm:$0xff]  ;;  %v627_v9 = vld [vmem:[%s2759_s6 + $0x398] sm:$0xff] }
 0x19a   :  { %v611_v10 = vld [vmem:[%s2759_s6 + $0x318] sm:$0xff] }
 0x19b   :  { %v511_v12 = vmax.f32 %v508_v11, 0.0  ;;  %v626_v11 = vld [vmem:[%s2759_s6 + $0x390] sm:$0xff] }
 0x19d   :  { %768 = vmatprep.mubr.f32.mxu0 %v511_v12  ;;  %v610_v12 = vld [vmem:[%s2759_s6 + $0x310] sm:$0xff] }
 0x19e   :  { %769 = vmatmul.mubr.f32.vlgmr.msra.gmra.mxu0 %v510_v14  ;;  %v609_v14 = vld [vmem:[%s2759_s6 + $0x308] sm:$0xff] }
 0x19f   :  { %1363 = vmatpush3.msra.mxu0 %v559_v15  ;;  %963 = vmatprep.mubr.f32.mxu0 %v793_v13  ;;  %v625_v13 = vld [vmem:[%s2759_s6 + $0x388] sm:$0xff]  ;;  %v624_v15 = vld [vmem:[%s2759_s6 + $0x380] sm:$0xff] }
 0x1a0   :  { %1364 = vmatprep.subr.mxu0 %v574_v19  ;;  %v608_v19 = vld [vmem:[%s2759_s6 + $0x300] sm:$0xff] }
 0x1a1   :  { %1365 = vmatpush3.msra.mxu0 %v558_v20  ;;  %v1203_v20 = vld [vmem:[%s2763_s9 + $0x78] sm:$0xff] }
 0x1a2   :  { %1366 = vmatprep.subr.mxu0 %v573_v22  ;;  %v1202_v22 = vld [vmem:[%s2763_s9 + $0x70] sm:$0xff] }
 0x1a3   :  { %1367 = vmatpush3.msra.mxu0 %v557_v16  ;;  %v1201_v16 = vld [vmem:[%s2763_s9 + $0x68] sm:$0xff] }
 0x1a4   :  { %1368 = vmatprep.subr.mxu0 %v572_v17  ;;  %v1199_v17 = vld [vmem:[%s2763_s9 + $0x58] sm:$0xff] }
 0x1a5   :  { %1369 = vmatpush3.msra.mxu0 %v556_v21  ;;  %v1198_v21 = vld [vmem:[%s2763_s9 + $0x50] sm:$0xff] }
 0x1a6   :  { %1370 = vmatprep.subr.mxu0 %v571_v23  ;;  %v1197_v23 = vld [vmem:[%s2763_s9 + $0x48] sm:$0xff] }
 0x1a7   :  { %1371 = vmatpush3.msra.mxu0 %v555_v24  ;;  %v1196_v24 = vld [vmem:[%s2763_s9 + $0x40] sm:$0xff] }
 0x1a8   :  { %1372 = vmatprep.subr.mxu0 %v570_v25  ;;  %v1195_v25 = vld [vmem:[%s2763_s9 + $0x38] sm:$0xff] }
 0x1a9   :  { %1373 = vmatpush3.msra.mxu0 %v554_v26  ;;  %v1194_v26 = vld [vmem:[%s2763_s9 + $0x30] sm:$0xff] }
 0x1aa   :  { %1374 = vmatprep.subr.mxu0 %v569_v27  ;;  %v1193_v27 = vld [vmem:[%s2763_s9 + $0x28] sm:$0xff] }
 0x1ab   :  { %1375 = vmatpush3.msra.mxu0 %v553_v28  ;;  %v1192_v28 = vld [vmem:[%s2763_s9 + $0x20] sm:$0xff] }
 0x1ac   :  { %1376 = vmatprep.subr.mxu0 %v568_v29  ;;  %v1191_v29 = vld [vmem:[%s2763_s9 + $0x18] sm:$0xff] }
 0x1ad   :  { %1377 = vmatpush3.msra.mxu0 %v552_v30  ;;  %v1190_v30 = vld [vmem:[%s2763_s9 + $0x10] sm:$0xff] }
 0x1ae   :  { %1378 = vmatprep.subr.mxu0 %v567_v31  ;;  %v1189_v31 = vld [vmem:[%s2763_s9 + $0x8] sm:$0xff] }
 0x1af   :  { %1379 = vmatpush3.msra.mxu0 %v551_v32  ;;  %v1188_v32 = vld [vmem:[%s2763_s9] sm:$0xff] }
 0x1b0   :  { %1380 = vmatprep.subr.mxu0 %v566_v33  ;;  %v16_v33 = vstv %s2764_s10 }
 0x1b1   :  { %1381 = vmatpush3.msra.mxu0 %v550_v34  ;;  %17 = vst [vmem:[#allocation2] sm:$0x1] %v16_v33 }
 0x1b2   :  { %1382 = vmatprep.subr.mxu0 %v565_v35 }
 0x1b3   :  { %1383 = vmatpush3.msra.mxu0 %v549_v36 }
 0x1b4   :  { %1384 = vmatprep.subr.mxu0 %v564_v37 }
 0x1b5   :  { %1385 = vmatpush3.msra.mxu0 %v548_v39 }
 0x1b6   :  { %1386 = vmatprep.subr.mxu0 %v563_v40  ;;  %v1359_v35 = vpop.f32.mrf.mxu1 }
 0x1b7   :  { %1387 = vmatpush3.msra.mxu0 %v547_v41 }
 0x1b8   :  { %1388 = vmatprep.subr.mxu0 %v562_v42  ;;  %v1360_v39 = vpop.f32.mrf.mxu1 }
 0x1b9   :  { %1389 = vmatpush3.msra.mxu0 %v546_v43  ;;  %v1361_v43 = vadd.f32 %v1360_v39, %v1359_v35 }
 0x1ba   :  { %1390 = vmatprep.subr.mxu0 %v561_v44 }
 0x1bb   :  { %1391 = vmatpush3.msra.mxu0 %v545_v45 }
 0x1bc   :  { %1392 = vmatprep.subr.mxu0 %v560_v46 }
 0x1bd   :  { %1393 = vmatpush3.msra.mxu0 %v544_v47 }
 0x1be   :  { %964 = vmatmul.mubr.f32.vlgmr.msra.gmra.mxu0 %v2357_v18  ;;  %1432 = vmatprep.subr.mxu0 %v639_v48  ;;  %v636_v18 = vld [vmem:[%s2759_s6 + $0x3e0] sm:$0xff] }
 0x1bf   :  { %1433 = vmatpush3.msra.mxu0 %v623_v50  ;;  %1103 = vmatprep.mubr.f32.mxu0 %v810_v49 }
 0x1c0   :  { %1434 = vmatprep.subr.mxu0 %v638_v51 }
 0x1c1   :  { %1435 = vmatpush3.msra.mxu0 %v622_v52 }
 0x1c2   :  { %1436 = vmatprep.subr.mxu0 %v637_v53 }
 0x1c3   :  { %1437 = vmatpush3.msra.mxu0 %v621_v54 }
 0x1c4   :  { %1438 = vmatprep.subr.mxu0 %v636_v18 }
 0x1c5   :  { %1439 = vmatpush3.msra.mxu0 %v620_v55  ;;  %v1290_v55 = vld [vmem:[%s2765_s8] ss:$0 sm:$0xff] }
 0x1c6   :  { %1440 = vmatprep.subr.mxu0 %v635_v56 }
 0x1c7   :  { %1441 = vmatpush3.msra.mxu0 %v619_v57 }
 0x1c8   :  { %1442 = vmatprep.subr.mxu0 %v634_v58 }
 0x1c9   :  { %1443 = vmatpush3.msra.mxu0 %v618_v60  ;;  %v1291_v60 = vld [vmem:[#allocation2] ss:$0 sm:$0xff] }
 0x1ca   :  { %1444 = vmatprep.subr.mxu0 %v633_v61 }
 0x1cb   :  { %1445 = vmatpush3.msra.mxu0 %v617_v62 }
 0x1cc   :  { %1446 = vmatprep.subr.mxu0 %v632_v63 }
 0x1cd   :  { %1447 = vmatpush3.msra.mxu0 %v616_v38 }
 0x1ce   :  { %1448 = vmatprep.subr.mxu0 %v631_v0 }
 0x1cf   :  { %1449 = vmatpush3.msra.mxu0 %v615_v1 }
 0x1d0   :  { %1450 = vmatprep.subr.mxu0 %v630_v2 }
 0x1d1   :  { %1451 = vmatpush3.msra.mxu0 %v614_v4 }
 0x1d2   :  { %1452 = vmatprep.subr.mxu0 %v629_v5 }
 0x1d3   :  { %1453 = vmatpush3.msra.mxu0 %v613_v6 }
 0x1d4   :  { %1454 = vmatprep.subr.mxu0 %v628_v7 }
 0x1d5   :  { %1455 = vmatpush3.msra.mxu0 %v612_v8 }
 0x1d6   :  { %1456 = vmatprep.subr.mxu0 %v627_v9  ;;  %v1429_v40 = vpop.f32.mrf.mxu1 }
 0x1d7   :  { %1457 = vmatpush3.msra.mxu0 %v611_v10 }
 0x1d8   :  { %1458 = vmatprep.subr.mxu0 %v626_v11  ;;  %v1430_v45 = vpop.f32.mrf.mxu1 }
 0x1d9   :  { %1459 = vmatpush3.msra.mxu0 %v610_v12 }
 0x1da   :  { %1460 = vmatprep.subr.mxu0 %v625_v13 }
 0x1db   :  { %1461 = vmatpush3.msra.mxu0 %v609_v14 }
 0x1dc   :  { %1462 = vmatprep.subr.mxu0 %v624_v15 }
 0x1dd   :  { %1463 = vmatpush3.msra.mxu0 %v608_v19 }
 0x1de   :  { %1104 = vmatmul.mubr.f32.vlgmr.msra.gmra.mxu0 %v2465_v59  ;;  %1519 = vmatprep.subr.mxu0 %v1559_v3  ;;  %v1200_v59 = vld [vmem:[%s2763_s9 + $0x60] sm:$0xff] }
 0x1df   :  { %1520 = vmatpush3.msra.mxu0 %v1203_v20  ;;  %1551 = vmatprep.mubr.msk.f32.mxu0 %vm1561_vm1, %v1559_v3 }
 0x1e0   :  { %1521 = vmatprep.subr.mxu0 %v1559_v3 }
 0x1e1   :  { %1522 = vmatpush3.msra.mxu0 %v1202_v22 }
 0x1e2   :  { %1523 = vmatprep.subr.mxu0 %v1559_v3 }
 0x1e3   :  { %1524 = vmatpush3.msra.mxu0 %v1201_v16 }
 0x1e4   :  { %1525 = vmatprep.subr.mxu0 %v1559_v3 }
 0x1e5   :  { %1526 = vmatpush3.msra.mxu0 %v1200_v59 }
 0x1e6   :  { %1527 = vmatprep.subr.mxu0 %v1559_v3 }
 0x1e7   :  { %1528 = vmatpush3.msra.mxu0 %v1199_v17 }
 0x1e8   :  { %1529 = vmatprep.subr.mxu0 %v1559_v3 }
 0x1e9   :  { %1530 = vmatpush3.msra.mxu0 %v1198_v21 }
 0x1ea   :  { %1531 = vmatprep.subr.mxu0 %v1559_v3 }
 0x1eb   :  { %1532 = vmatpush3.msra.mxu0 %v1197_v23 }
 0x1ec   :  { %1533 = vmatprep.subr.mxu0 %v1559_v3 }
 0x1ed   :  { %1534 = vmatpush3.msra.mxu0 %v1196_v24 }
 0x1ee   :  { %1535 = vmatprep.subr.mxu0 %v1559_v3 }
 0x1ef   :  { %1536 = vmatpush3.msra.mxu0 %v1195_v25 }
 0x1f0   :  { %1537 = vmatprep.subr.mxu0 %v1559_v3 }
 0x1f1   :  { %1538 = vmatpush3.msra.mxu0 %v1194_v26 }
 0x1f2   :  { %1539 = vmatprep.subr.mxu0 %v1559_v3 }
 0x1f3   :  { %1540 = vmatpush3.msra.mxu0 %v1193_v27 }
 0x1f4   :  { %1541 = vmatprep.subr.mxu0 %v1559_v3 }
 0x1f5   :  { %1542 = vmatpush3.msra.mxu0 %v1192_v28 }
 0x1f6   :  { %1543 = vmatprep.subr.mxu0 %v1559_v3  ;;  %v1499_v47 = vpop.f32.mrf.mxu1 }
 0x1f7   :  { %1544 = vmatpush3.msra.mxu0 %v1191_v29 }
 0x1f8   :  { %1545 = vmatprep.subr.mxu0 %v1559_v3  ;;  %v1500_v51 = vpop.f32.mrf.mxu1 }
 0x1f9   :  { %1546 = vmatpush3.msra.mxu0 %v1190_v30  ;;  %v1501_v18 = vadd.f32 %v1500_v51, %v1499_v47 }
 0x1fa   :  { %1547 = vmatprep.subr.mxu0 %v1559_v3 }
 0x1fb   :  { %1548 = vmatpush3.msra.mxu0 %v1189_v31 }
 0x1fc   :  { %1549 = vmatprep.subr.mxu0 %v1559_v3  ;;  %v1431_v3 = vadd.f32 %v1430_v45, %v1429_v40 }
 0x1fd   :  { %1550 = vmatpush3.msra.mxu0 %v1188_v32 }
 0x25e   :  { %v1324_v34 = vpop.f32.mrf.mxu0 }
 0x260   :  { %v1325_v36 = vpop.f32.mrf.mxu0 }
 0x261   :  { %v1326_v42 = vadd.f32 %v1325_v36, %v1324_v34 }
 0x263   :  { %v896_v46 = vadd.f32 %v1361_v43, %v1326_v42 }
 0x27e   :  { %v1394_v37 = vpop.f32.mrf.mxu0 }
 0x280   :  { %v1395_v41 = vpop.f32.mrf.mxu0 }
 0x281   :  { %v1396_v44 = vadd.f32 %v1395_v41, %v1394_v37 }
 0x283   :  { %v966_v48 = vadd.f32 %v1396_v44, %v896_v46 }
 0x285   :  { %v1036_v52 = vadd.f32 %v1431_v3, %v966_v48 }
 0x29e   :  { %v1464_v49 = vpop.f32.mrf.mxu0 }
 0x2a0   :  { %v1465_v50 = vpop.f32.mrf.mxu0 }
 0x2a1   :  { %v1466_v53 = vadd.f32 %v1465_v50, %v1464_v49 }
 0x2a3   :  { %v1106_v54 = vadd.f32 %v1466_v53, %v1036_v52 }
 0x2a5   :  { %v1176_v56 = vadd.f32 %v1501_v18, %v1106_v54 }
 0x2a7   :  { %v1186_v57 = vadd.f32 %v1290_v55, %v1176_v56 }
 0x2a9   :  { %v1187_v58 = vmax.f32 %v1186_v57, 0.0 }
 0x2ab   :  { %1552 = vmatmul.mubr.f32.vlgmr.msra.gmra.mxu0 %v1187_v58 }
 0x36b   :  { %v1277_v61 = vpop.f32.mrf.mxu0 }
 0x36c   :  { %v1278_v62 = vadd.f32 %v1291_v60, %v1277_v61 }
 0x36d   :  { %v1553_v63 = vpop.f32.mrf.mxu0 }
 0x36e   :  { %1282 = vst.msk [vmem:[%s2766_s11] sm:$0x3] %vm1281_vm2, %v1278_v62 }

</bundles_post_ra>
